<compile_context>
chip_gen: v5e
topology: v5e:2x2
jax: 0.10.0
libtpu: 0.0.40
codegen_flags: <defaults>
</compile_context>

<pallas_src>
import functools

import jax
import jax.numpy as jnp
import numpy as np
from jax import lax
from jax.experimental import pallas as pl
from jax.experimental.pallas import tpu as pltpu

EPS = 1e-5  # nn.GroupNorm default


# ----------------------------- kernel-side helpers -----------------------------
def _group_combine(s, G):
    """Replicate per-group sums back to every channel of the group.

    s: (C, 1) per-channel sums for ONE image.  Groups are blocks of
    cpg = C // G consecutive channels (PyTorch GroupNorm convention).  Uses
    sublane rolls + a parity/offset select -- pure VPU/XLU work, no MXU."""
    C = s.shape[0]
    cpg = C // G
    if cpg == 1:
        return s
    idx = lax.broadcasted_iota(jnp.int32, s.shape, 0) % cpg
    out = s
    for d in range(1, cpg):
        down = pltpu.roll(s, (C - d) % C, 0)   # down[i] = s[(i + d) % C]
        up = pltpu.roll(s, cpg - d, 0)         # up[i]   = s[(i - (cpg - d)) % C]
        # within a group block: position r takes s[r+d] if r+d < cpg else s[r+d-cpg]
        out = out + jnp.where(idx < cpg - d, down, up)
    return out


def _gn_scale_bias(chunk, G, gamma, beta):
    """Per-image GroupNorm fused scale/bias so the apply is one mul + one add.

    chunk: (C, HW) f32 for a single image.  Returns (C,1) scale/shift with
    y = chunk * scale + shift  ==  (chunk - mean) * rsqrt(var+eps) * gamma + beta."""
    C, n_sp = chunk.shape
    cpg = C // G
    inv_n = 1.0 / float(cpg * n_sp)
    s1 = jnp.sum(chunk, axis=1, keepdims=True)               # (C, 1)
    s2 = jnp.sum(chunk * chunk, axis=1, keepdims=True)       # (C, 1)
    mean = _group_combine(s1, G) * inv_n
    ex2 = _group_combine(s2, G) * inv_n
    var = jnp.maximum(ex2 - mean * mean, 0.0)
    a = lax.rsqrt(var + EPS)
    scale = a * gamma
    shift = beta - mean * scale
    return scale, shift


def _group_norm(v, NB, HW, G, gamma, beta):
    """GroupNorm on v: (C, NB*HW); statistics are per 256-lane image chunk."""
    pieces = []
    for b in range(NB):
        chunk = v[:, b * HW:(b + 1) * HW]
        sc, sh = _gn_scale_bias(chunk, G, gamma, beta)
        pieces.append(chunk * sc + sh)
    return pieces[0] if NB == 1 else jnp.concatenate(pieces, axis=1)


def _group_norm_store(v, NB, HW, G, gamma, beta, out_ref):
    """Final GroupNorm: write each image chunk straight to out_ref (lane-dense)."""
    for b in range(NB):
        chunk = v[:, b * HW:(b + 1) * HW]
        sc, sh = _gn_scale_bias(chunk, G, gamma, beta)
        out_ref[:, b * HW:(b + 1) * HW] = (chunk * sc + sh).astype(out_ref.dtype)


def _im2col(v, mask, K, W):
    """Fused conv operand (K*K*Cin, L) from v: (Cin, L), L = NB*HW.

    The (dy, dx) tap is a lane rotation of the concatenated spatial axis by
    (dy-P)*W + (dx-P); every position whose tap samples outside its OWN image
    (including positions that would wrap or cross an image boundary) is zeroed
    by the precomputed border mask, which realizes 'SAME' zero padding."""
    P = K // 2
    L = v.shape[-1]
    pieces = []
    for dy in range(K):
        for dx in range(K):
            t = dy * K + dx
            s = (dy - P) * W + (dx - P)                 # flat source offset
            if s == 0:
                pieces.append(v)                        # center tap: mask is all-ones
            else:
                shifted = pltpu.roll(v, (-s) % L, 1)    # shifted[p] = v[p + s]
                pieces.append(shifted * mask[t:t + 1, :])
    return jnp.concatenate(pieces, axis=0)


def _resnet_layer_kernel(K, W, HW, NB, G,
                         z_ref, x_ref, w1_ref, w2_ref, mask_ref,
                         p1_ref, p23_ref, out_ref):
    cdt = w1_ref.dtype        # conv (MXU) operand dtype; bf16 on v6e/v7x, f32 on v5e
    z = z_ref[...]            # (Cn, NB*HW) f32
    x = x_ref[...]            # (Cn, NB*HW) f32
    mask = mask_ref[...]      # (K*K, NB*HW) in cdt

    # ---- conv1(z): one wide fused im2col matmul on the MXU ----
    col1 = _im2col(z.astype(cdt), mask, K, W)                       # (K*K*Cn, L)
    h = jnp.dot(w1_ref[...], col1, preferred_element_type=jnp.float32)  # (Ci, L)

    # ---- y = norm1(relu(conv1(z))) ----
    y = _group_norm(jnp.maximum(h, 0.0), NB, HW, G,
                    p1_ref[:, 0:1], p1_ref[:, 1:2])

    # ---- conv2(y): one wide fused im2col matmul ----
    col2 = _im2col(y.astype(cdt), mask, K, W)                       # (K*K*Ci, L)
    c2 = jnp.dot(w2_ref[...], col2, preferred_element_type=jnp.float32)  # (Cn, L)

    # ---- out = norm3(relu(z + norm2(x + conv2(y)))) ----
    v = _group_norm(x + c2, NB, HW, G, p23_ref[:, 0:1], p23_ref[:, 1:2])
    v = jnp.maximum(z + v, 0.0)
    _group_norm_store(v, NB, HW, G, p23_ref[:, 2:3], p23_ref[:, 3:4], out_ref)


# ----------------------------- host-side helpers -----------------------------
def _conv_masks(H, W, K):
    """(K*K, H*W) validity masks: 1 where the (dy,dx) tap samples inside the image."""
    P = K // 2
    i = np.arange(H)[:, None]
    j = np.arange(W)[None, :]
    rows = []
    for dy in range(K):
        for dx in range(K):
            valid = ((i + dy - P >= 0) & (i + dy - P < H) &
                     (j + dx - P >= 0) & (j + dx - P < W))
            rows.append(valid.reshape(-1))
    return jnp.asarray(np.stack(rows).astype(np.float32))


def _pick_nb(N, nb_target):
    """Images per grid step: a divisor of N, <= nb_target, keeping >= 2 grid
    steps whenever N >= 2 (v7x has 2 TensorCores to shard the grid over)."""
    nb = max(1, min(int(nb_target), N))
    while N % nb:
        nb -= 1
    if N >= 2 and N // nb < 2:
        nb2 = nb - 1
        while nb2 >= 1 and (N % nb2 or N // nb2 < 2):
            nb2 -= 1
        if nb2 >= 1:
            nb = nb2
    return nb


def resnet_layer_forward(z_nchw, x_nchw, w1_oihw, w2_oihw, params, num_groups,
                         *, mxu_dtype=jnp.bfloat16, nb_target=16,
                         vmem_limit_bytes=32 * 1024 * 1024):
    """Pallas forward.  params = (g1, b1, g2, b2, g3, b3) GroupNorm affine params.

    `mxu_dtype` only affects the conv matmul operands (use jnp.float32 on v5e);
    accumulation, GroupNorm statistics and all elementwise math stay in f32.
    `nb_target` images are packed along the lane axis per grid step; raise it
    (together with vmem_limit_bytes) on v6e/v7x for bigger, better-amortized steps."""
    N, Cn, H, W = z_nchw.shape
    Ci, _, K, _ = w1_oihw.shape
    HW = H * W
    NB = _pick_nb(N, nb_target)
    steps = N // NB
    L = NB * HW
    assert steps == 1 or (L % 128 == 0), "lane block must be a multiple of 128"

    # Channel-major with images concatenated along lanes: (C, N*HW).
    # (One cheap host-side transpose; NCHW -> (C, N, HW) -> (C, N*HW).)
    z2 = jnp.transpose(z_nchw.reshape(N, Cn, HW), (1, 0, 2)).reshape(Cn, N * HW)
    x2 = jnp.transpose(x_nchw.reshape(N, Cn, HW), (1, 0, 2)).reshape(Cn, N * HW)
    z2 = z2.astype(jnp.float32)
    x2 = x2.astype(jnp.float32)

    # (Cout, Cin, kh, kw) -> (Cout, K*K*Cin), column index (kh*K+kw)*Cin + cin,
    # matching the im2col row order built in-kernel.
    w1 = jnp.transpose(w1_oihw, (0, 2, 3, 1)).reshape(Ci, K * K * Cn).astype(mxu_dtype)
    w2 = jnp.transpose(w2_oihw, (0, 2, 3, 1)).reshape(Cn, K * K * Ci).astype(mxu_dtype)

    # Border masks tiled to NB images along lanes (also zero every position
    # whose tap would cross an image boundary in the concatenated layout).
    mask = jnp.tile(_conv_masks(H, W, K), (1, NB)).astype(mxu_dtype)   # (K*K, L)

    g1, b1, g2, b2, g3, b3 = [p.astype(jnp.float32) for p in params]
    p1 = jnp.stack([g1, b1], axis=1)                 # (Ci, 2)
    p23 = jnp.stack([g2, b2, g3, b3], axis=1)        # (Cn, 4)

    kernel = functools.partial(_resnet_layer_kernel, K, W, HW, NB, num_groups)

    def full_spec(a):
        nd = a.ndim
        return pl.BlockSpec(a.shape, lambda g, _nd=nd: (0,) * _nd)

    img_spec = pl.BlockSpec((Cn, L), lambda g: (0, g))

    flops = 4 * N * HW * K * K * Cn * Ci            # two convs, 2 flops/MAC
    bytes_accessed = (4 * 3 * N * Cn * HW
                      + w1.size * w1.dtype.itemsize + w2.size * w2.dtype.itemsize
                      + mask.size * mask.dtype.itemsize
                      + 4 * (p1.size + p23.size))

    out2 = pl.pallas_call(
        kernel,
        grid=(steps,),
        out_shape=jax.ShapeDtypeStruct((Cn, N * HW), jnp.float32),
        in_specs=[img_spec, img_spec,
                  full_spec(w1), full_spec(w2), full_spec(mask),
                  full_spec(p1), full_spec(p23)],
        out_specs=img_spec,
        compiler_params=pltpu.CompilerParams(
            dimension_semantics=("parallel",),
            vmem_limit_bytes=int(vmem_limit_bytes)),
        cost_estimate=pl.CostEstimate(flops=int(flops),
                                      transcendentals=int(N * (Ci + 2 * Cn)),
                                      bytes_accessed=int(bytes_accessed)),
    )(z2, x2, w1, w2, mask, p1, p23)

    # (C, N*HW) -> NCHW (lane-dense store inside the kernel; cheap host transpose back).
    return jnp.transpose(out2.reshape(Cn, N, HW), (1, 0, 2)).reshape(N, Cn, H, W)


# ----------------------------- pure-JAX reference -----------------------------
def _group_norm_ref(v, gamma, beta, G, eps=EPS):
    N, H, W, C = v.shape
    vg = v.reshape(N, H, W, G, C // G)
    mean = jnp.mean(vg, axis=(1, 2, 4), keepdims=True)
    var = jnp.mean((vg - mean) ** 2, axis=(1, 2, 4), keepdims=True)
    vn = (vg - mean) / jnp.sqrt(var + eps)
    return vn.reshape(N, H, W, C) * gamma.reshape(1, 1, 1, C) + beta.reshape(1, 1, 1, C)


def resnet_layer_reference(z_nchw, x_nchw, w1_oihw, w2_oihw, params, num_groups):
    g1, b1, g2, b2, g3, b3 = params
    z = jnp.transpose(z_nchw, (0, 2, 3, 1))
    x = jnp.transpose(x_nchw, (0, 2, 3, 1))
    w1 = jnp.transpose(w1_oihw, (2, 3, 1, 0))
    w2 = jnp.transpose(w2_oihw, (2, 3, 1, 0))

    def conv(a, w):
        return lax.conv_general_dilated(
            a, w, (1, 1), "SAME",
            dimension_numbers=("NHWC", "HWIO", "NHWC"),
            precision=lax.Precision.HIGHEST)

    y = _group_norm_ref(jax.nn.relu(conv(z, w1)), g1, b1, num_groups)
    y = _group_norm_ref(
        jax.nn.relu(z + _group_norm_ref(x + conv(y, w2), g2, b2, num_groups)),
        g3, b3, num_groups)
    return jnp.transpose(y, (0, 3, 1, 2))


if __name__ == "__main__":
    # ResNetLayer(n_channels=8, n_inner_channels=16, kernel_size=3, num_groups=8)
    N, Cn, Ci, H, W, K, G = 2, 8, 16, 16, 16, 3, 8

    keys = jax.random.split(jax.random.PRNGKey(0), 12)
    z = jax.random.normal(keys[0], (N, Cn, H, W), jnp.float32)
    x = jax.random.normal(keys[1], (N, Cn, H, W), jnp.float32)
    # Conv2d weights ~ N(0, 0.01), no bias (matches _initialize_weights)
    w1 = 0.01 * jax.random.normal(keys[2], (Ci, Cn, K, K), jnp.float32)
    w2 = 0.01 * jax.random.normal(keys[3], (Cn, Ci, K, K), jnp.float32)
    # Non-trivial GroupNorm affine params to exercise the scale/shift path.
    params = (1.0 + 0.1 * jax.random.normal(keys[4], (Ci,), jnp.float32),
              0.1 * jax.random.normal(keys[5], (Ci,), jnp.float32),
              1.0 + 0.1 * jax.random.normal(keys[6], (Cn,), jnp.float32),
              0.1 * jax.random.normal(keys[7], (Cn,), jnp.float32),
              1.0 + 0.1 * jax.random.normal(keys[8], (Cn,), jnp.float32),
              0.1 * jax.random.normal(keys[9], (Cn,), jnp.float32))

    ref = np.asarray(jax.block_until_ready(
        resnet_layer_reference(z, x, w1, w2, params, G)))

    # Small batch (N=2 -> NB=1, 2 grid steps), f32 MXU operands: tight check.
    out = jax.block_until_ready(
        resnet_layer_forward(z, x, w1, w2, params, G, mxu_dtype=jnp.float32))
    assert out.shape == (N, Cn, H, W)
    np.testing.assert_allclose(np.asarray(out), ref, atol=2e-3, rtol=2e-3)

    # Larger batch exercising lane packing (N=8, NB=4 images per grid step).
    N8 = 8
    z8 = jax.random.normal(keys[10], (N8, Cn, H, W), jnp.float32)
    x8 = jax.random.normal(keys[11], (N8, Cn, H, W), jnp.float32)
    ref8 = np.asarray(jax.block_until_ready(
        resnet_layer_reference(z8, x8, w1, w2, params, G)))

    out8 = jax.block_until_ready(
        resnet_layer_forward(z8, x8, w1, w2, params, G,
                             mxu_dtype=jnp.float32, nb_target=4))
    np.testing.assert_allclose(np.asarray(out8), ref8, atol=2e-3, rtol=2e-3)

    # bf16 MXU-operand path (the perf configuration on v6e/v7x): looser check.
    out8_bf16 = jax.block_until_ready(
        resnet_layer_forward(z8, x8, w1, w2, params, G,
                             mxu_dtype=jnp.bfloat16, nb_target=4))
    np.testing.assert_allclose(np.asarray(out8_bf16), ref8, atol=1e-2, rtol=1e-2)

    print("KERNEL_OK")
</pallas_src>

<mosaic_0001>
module attributes {stable_mosaic.version = 11 : i64} {
  func.func @_resnet_layer_kernel(%arg0: i32, %arg1: memref<8x256xf32, #tpu.memory_space<vmem>>, %arg2: memref<8x256xf32, #tpu.memory_space<vmem>>, %arg3: memref<16x72xf32, #tpu.memory_space<vmem>>, %arg4: memref<8x144xf32, #tpu.memory_space<vmem>>, %arg5: memref<9x256xf32, #tpu.memory_space<vmem>>, %arg6: memref<16x2xf32, #tpu.memory_space<vmem>>, %arg7: memref<8x4xf32, #tpu.memory_space<vmem>>, %arg8: memref<8x256xf32, #tpu.memory_space<vmem>>) attributes {dimension_semantics = [#tpu.dimension_semantics<parallel>], iteration_bounds = array<i64: 2>, scalar_prefetch = 0 : i64, scratch_operands = 0 : i64, tpu.core_type = #tpu.core_type<tc>, window_params = [{transform_indices = @transform_0, window_bounds = array<i64: 8, 256>}, {transform_indices = @transform_1, window_bounds = array<i64: 8, 256>}, {pipeline_mode = #tpu.pipeline_mode<synchronous>, transform_indices = @transform_2, window_bounds = array<i64: 16, 72>}, {pipeline_mode = #tpu.pipeline_mode<synchronous>, transform_indices = @transform_3, window_bounds = array<i64: 8, 144>}, {pipeline_mode = #tpu.pipeline_mode<synchronous>, transform_indices = @transform_4, window_bounds = array<i64: 9, 256>}, {pipeline_mode = #tpu.pipeline_mode<synchronous>, transform_indices = @transform_5, window_bounds = array<i64: 16, 2>}, {pipeline_mode = #tpu.pipeline_mode<synchronous>, transform_indices = @transform_6, window_bounds = array<i64: 8, 4>}, {transform_indices = @transform_7, window_bounds = array<i64: 8, 256>}]} {
    %c0 = arith.constant 0 : index
    %c0_0 = arith.constant 0 : index
    %0 = vector.load %arg1[%c0, %c0_0] : memref<8x256xf32, #tpu.memory_space<vmem>>, vector<8x256xf32>
    %c0_1 = arith.constant 0 : index
    %c0_2 = arith.constant 0 : index
    %1 = vector.load %arg2[%c0_1, %c0_2] : memref<8x256xf32, #tpu.memory_space<vmem>>, vector<8x256xf32>
    %c0_3 = arith.constant 0 : index
    %c0_4 = arith.constant 0 : index
    %2 = vector.load %arg5[%c0_3, %c0_4] : memref<9x256xf32, #tpu.memory_space<vmem>>, vector<9x256xf32>
    %c17_i32 = arith.constant 17 : i32
    %3 = tpu.dynamic_rotate %0 by %c17_i32 dim 1 : vector<8x256xf32>, i32 -> vector<8x256xf32>
    %4 = vector.extract_strided_slice %2 {offsets = [0, 0], sizes = [1, 256], strides = [1, 1]} : vector<9x256xf32> to vector<1x256xf32>
    %5 = vector.broadcast %4 : vector<1x256xf32> to vector<8x256xf32>
    %6 = arith.mulf %3, %5 : vector<8x256xf32>
    %c16_i32 = arith.constant 16 : i32
    %7 = tpu.dynamic_rotate %0 by %c16_i32 dim 1 : vector<8x256xf32>, i32 -> vector<8x256xf32>
    %8 = vector.extract_strided_slice %2 {offsets = [1, 0], sizes = [1, 256], strides = [1, 1]} : vector<9x256xf32> to vector<1x256xf32>
    %9 = vector.broadcast %8 : vector<1x256xf32> to vector<8x256xf32>
    %10 = arith.mulf %7, %9 : vector<8x256xf32>
    %c15_i32 = arith.constant 15 : i32
    %11 = tpu.dynamic_rotate %0 by %c15_i32 dim 1 : vector<8x256xf32>, i32 -> vector<8x256xf32>
    %12 = vector.extract_strided_slice %2 {offsets = [2, 0], sizes = [1, 256], strides = [1, 1]} : vector<9x256xf32> to vector<1x256xf32>
    %13 = vector.broadcast %12 : vector<1x256xf32> to vector<8x256xf32>
    %14 = arith.mulf %11, %13 : vector<8x256xf32>
    %c1_i32 = arith.constant 1 : i32
    %15 = tpu.dynamic_rotate %0 by %c1_i32 dim 1 : vector<8x256xf32>, i32 -> vector<8x256xf32>
    %16 = vector.extract_strided_slice %2 {offsets = [3, 0], sizes = [1, 256], strides = [1, 1]} : vector<9x256xf32> to vector<1x256xf32>
    %17 = vector.broadcast %16 : vector<1x256xf32> to vector<8x256xf32>
    %18 = arith.mulf %15, %17 : vector<8x256xf32>
    %c255_i32 = arith.constant 255 : i32
    %19 = tpu.dynamic_rotate %0 by %c255_i32 dim 1 : vector<8x256xf32>, i32 -> vector<8x256xf32>
    %20 = vector.extract_strided_slice %2 {offsets = [5, 0], sizes = [1, 256], strides = [1, 1]} : vector<9x256xf32> to vector<1x256xf32>
    %21 = vector.broadcast %20 : vector<1x256xf32> to vector<8x256xf32>
    %22 = arith.mulf %19, %21 : vector<8x256xf32>
    %c241_i32 = arith.constant 241 : i32
    %23 = tpu.dynamic_rotate %0 by %c241_i32 dim 1 : vector<8x256xf32>, i32 -> vector<8x256xf32>
    %24 = vector.extract_strided_slice %2 {offsets = [6, 0], sizes = [1, 256], strides = [1, 1]} : vector<9x256xf32> to vector<1x256xf32>
    %25 = vector.broadcast %24 : vector<1x256xf32> to vector<8x256xf32>
    %26 = arith.mulf %23, %25 : vector<8x256xf32>
    %c240_i32 = arith.constant 240 : i32
    %27 = tpu.dynamic_rotate %0 by %c240_i32 dim 1 : vector<8x256xf32>, i32 -> vector<8x256xf32>
    %28 = vector.extract_strided_slice %2 {offsets = [7, 0], sizes = [1, 256], strides = [1, 1]} : vector<9x256xf32> to vector<1x256xf32>
    %29 = vector.broadcast %28 : vector<1x256xf32> to vector<8x256xf32>
    %30 = arith.mulf %27, %29 : vector<8x256xf32>
    %c239_i32 = arith.constant 239 : i32
    %31 = tpu.dynamic_rotate %0 by %c239_i32 dim 1 : vector<8x256xf32>, i32 -> vector<8x256xf32>
    %32 = vector.extract_strided_slice %2 {offsets = [8, 0], sizes = [1, 256], strides = [1, 1]} : vector<9x256xf32> to vector<1x256xf32>
    %33 = vector.broadcast %32 : vector<1x256xf32> to vector<8x256xf32>
    %34 = arith.mulf %31, %33 : vector<8x256xf32>
    %35 = tpu.concatenate %6, %10, %14, %18, %0, %22, %26, %30, %34 in 0 : vector<8x256xf32>, vector<8x256xf32>, vector<8x256xf32>, vector<8x256xf32>, vector<8x256xf32>, vector<8x256xf32>, vector<8x256xf32>, vector<8x256xf32>, vector<8x256xf32> -> vector<72x256xf32>
    %c0_5 = arith.constant 0 : index
    %c0_6 = arith.constant 0 : index
    %36 = vector.load %arg3[%c0_5, %c0_6] : memref<16x72xf32, #tpu.memory_space<vmem>>, vector<16x72xf32>
    %cst = arith.constant dense<0.000000e+00> : vector<16x256xf32>
    %37 = tpu.matmul %36, %35, %cst {dimension_numbers = #tpu.dot_dimension_numbers<[1], [0], [0], [1], [0, 0, 1, 1], [], []>} : vector<16x72xf32>, vector<72x256xf32>, vector<16x256xf32> -> vector<16x256xf32>
    %cst_7 = arith.constant 0.000000e+00 : f32
    %38 = vector.broadcast %cst_7 : f32 to vector<16x256xf32>
    %39 = arith.maximumf %37, %38 : vector<16x256xf32>
    %c0_8 = arith.constant 0 : index
    %c0_9 = arith.constant 0 : index
    %40 = vector.load %arg6[%c0_8, %c0_9] : memref<16x2xf32, #tpu.memory_space<vmem>>, vector<16x1xf32>
    %c0_10 = arith.constant 0 : index
    %c1 = arith.constant 1 : index
    %41 = vector.load %arg6[%c0_10, %c1] : memref<16x2xf32, #tpu.memory_space<vmem>>, vector<16x1xf32>
    %cst_11 = arith.constant dense<0.000000e+00> : vector<16xf32>
    %42 = vector.multi_reduction <add>, %39, %cst_11 [1] : vector<16x256xf32> to vector<16xf32>
    %43 = vector.shape_cast %42 : vector<16xf32> to vector<16x1xf32>
    %44 = arith.mulf %39, %39 : vector<16x256xf32>
    %cst_12 = arith.constant dense<0.000000e+00> : vector<16xf32>
    %45 = vector.multi_reduction <add>, %44, %cst_12 [1] : vector<16x256xf32> to vector<16xf32>
    %46 = vector.shape_cast %45 : vector<16xf32> to vector<16x1xf32>
    %47 = tpu.iota {dimensions = array<i32: 0>} : vector<16x1xi32>
    %c2_i32 = arith.constant 2 : i32
    %c0_i32 = arith.constant 0 : i32
    %48 = arith.cmpi eq, %c2_i32, %c0_i32 : i32
    %c1_i32_13 = arith.constant 1 : i32
    %49 = arith.select %48, %c1_i32_13, %c2_i32 : i32
    %50 = vector.broadcast %49 : i32 to vector<16x1xi32>
    %51 = arith.remsi %47, %50 : vector<16x1xi32>
    %c0_i32_14 = arith.constant 0 : i32
    %52 = vector.broadcast %c0_i32_14 : i32 to vector<16x1xi32>
    %53 = arith.cmpi ne, %51, %52 : vector<16x1xi32>
    %c0_i32_15 = arith.constant 0 : i32
    %54 = vector.broadcast %c0_i32_15 : i32 to vector<16x1xi32>
    %55 = arith.cmpi slt, %51, %54 : vector<16x1xi32>
    %c0_i32_16 = arith.constant 0 : i32
    %56 = arith.cmpi slt, %49, %c0_i32_16 : i32
    %57 = vector.broadcast %56 : i1 to vector<16x1xi1>
    %58 = vector.broadcast %57 : vector<16x1xi1> to vector<16x1xi1>
    %59 = arith.xori %55, %58 : vector<16x1xi1>
    %60 = arith.andi %59, %53 : vector<16x1xi1>
    %61 = vector.broadcast %49 : i32 to vector<16x1xi32>
    %62 = arith.addi %51, %61 : vector<16x1xi32>
    %63 = arith.select %60, %62, %51 : vector<16x1xi1>, vector<16x1xi32>
    %c15_i32_17 = arith.constant 15 : i32
    %64 = tpu.dynamic_rotate %43 by %c15_i32_17 dim 0 : vector<16x1xf32>, i32 -> vector<16x1xf32>
    %c1_i32_18 = arith.constant 1 : i32
    %65 = tpu.dynamic_rotate %43 by %c1_i32_18 dim 0 : vector<16x1xf32>, i32 -> vector<16x1xf32>
    %c1_i32_19 = arith.constant 1 : i32
    %66 = vector.broadcast %c1_i32_19 : i32 to vector<16x1xi32>
    %67 = arith.cmpi slt, %63, %66 : vector<16x1xi32>
    %68 = arith.select %67, %64, %65 : vector<16x1xi1>, vector<16x1xf32>
    %69 = arith.addf %43, %68 : vector<16x1xf32>
    %cst_20 = arith.constant 0.001953125 : f32
    %70 = vector.broadcast %cst_20 : f32 to vector<16x1xf32>
    %71 = arith.mulf %69, %70 : vector<16x1xf32>
    %72 = tpu.iota {dimensions = array<i32: 0>} : vector<16x1xi32>
    %c2_i32_21 = arith.constant 2 : i32
    %c0_i32_22 = arith.constant 0 : i32
    %73 = arith.cmpi eq, %c2_i32_21, %c0_i32_22 : i32
    %c1_i32_23 = arith.constant 1 : i32
    %74 = arith.select %73, %c1_i32_23, %c2_i32_21 : i32
    %75 = vector.broadcast %74 : i32 to vector<16x1xi32>
    %76 = arith.remsi %72, %75 : vector<16x1xi32>
    %c0_i32_24 = arith.constant 0 : i32
    %77 = vector.broadcast %c0_i32_24 : i32 to vector<16x1xi32>
    %78 = arith.cmpi ne, %76, %77 : vector<16x1xi32>
    %c0_i32_25 = arith.constant 0 : i32
    %79 = vector.broadcast %c0_i32_25 : i32 to vector<16x1xi32>
    %80 = arith.cmpi slt, %76, %79 : vector<16x1xi32>
    %c0_i32_26 = arith.constant 0 : i32
    %81 = arith.cmpi slt, %74, %c0_i32_26 : i32
    %82 = vector.broadcast %81 : i1 to vector<16x1xi1>
    %83 = vector.broadcast %82 : vector<16x1xi1> to vector<16x1xi1>
    %84 = arith.xori %80, %83 : vector<16x1xi1>
    %85 = arith.andi %84, %78 : vector<16x1xi1>
    %86 = vector.broadcast %74 : i32 to vector<16x1xi32>
    %87 = arith.addi %76, %86 : vector<16x1xi32>
    %88 = arith.select %85, %87, %76 : vector<16x1xi1>, vector<16x1xi32>
    %c15_i32_27 = arith.constant 15 : i32
    %89 = tpu.dynamic_rotate %46 by %c15_i32_27 dim 0 : vector<16x1xf32>, i32 -> vector<16x1xf32>
    %c1_i32_28 = arith.constant 1 : i32
    %90 = tpu.dynamic_rotate %46 by %c1_i32_28 dim 0 : vector<16x1xf32>, i32 -> vector<16x1xf32>
    %c1_i32_29 = arith.constant 1 : i32
    %91 = vector.broadcast %c1_i32_29 : i32 to vector<16x1xi32>
    %92 = arith.cmpi slt, %88, %91 : vector<16x1xi32>
    %93 = arith.select %92, %89, %90 : vector<16x1xi1>, vector<16x1xf32>
    %94 = arith.addf %46, %93 : vector<16x1xf32>
    %cst_30 = arith.constant 0.001953125 : f32
    %95 = vector.broadcast %cst_30 : f32 to vector<16x1xf32>
    %96 = arith.mulf %94, %95 : vector<16x1xf32>
    %97 = arith.mulf %71, %71 : vector<16x1xf32>
    %98 = arith.subf %96, %97 : vector<16x1xf32>
    %cst_31 = arith.constant 0.000000e+00 : f32
    %99 = vector.broadcast %cst_31 : f32 to vector<16x1xf32>
    %100 = arith.maximumf %98, %99 : vector<16x1xf32>
    %cst_32 = arith.constant 9.99999974E-6 : f32
    %101 = vector.broadcast %cst_32 : f32 to vector<16x1xf32>
    %102 = arith.addf %100, %101 : vector<16x1xf32>
    %103 = math.rsqrt %102 : vector<16x1xf32>
    %104 = arith.mulf %103, %40 : vector<16x1xf32>
    %105 = arith.mulf %71, %104 : vector<16x1xf32>
    %106 = arith.subf %41, %105 : vector<16x1xf32>
    %107 = vector.broadcast %104 : vector<16x1xf32> to vector<16x256xf32>
    %108 = arith.mulf %39, %107 : vector<16x256xf32>
    %109 = vector.broadcast %106 : vector<16x1xf32> to vector<16x256xf32>
    %110 = arith.addf %108, %109 : vector<16x256xf32>
    %c17_i32_33 = arith.constant 17 : i32
    %111 = tpu.dynamic_rotate %110 by %c17_i32_33 dim 1 : vector<16x256xf32>, i32 -> vector<16x256xf32>
    %112 = vector.extract_strided_slice %2 {offsets = [0, 0], sizes = [1, 256], strides = [1, 1]} : vector<9x256xf32> to vector<1x256xf32>
    %113 = vector.broadcast %112 : vector<1x256xf32> to vector<16x256xf32>
    %114 = arith.mulf %111, %113 : vector<16x256xf32>
    %c16_i32_34 = arith.constant 16 : i32
    %115 = tpu.dynamic_rotate %110 by %c16_i32_34 dim 1 : vector<16x256xf32>, i32 -> vector<16x256xf32>
    %116 = vector.extract_strided_slice %2 {offsets = [1, 0], sizes = [1, 256], strides = [1, 1]} : vector<9x256xf32> to vector<1x256xf32>
    %117 = vector.broadcast %116 : vector<1x256xf32> to vector<16x256xf32>
    %118 = arith.mulf %115, %117 : vector<16x256xf32>
    %c15_i32_35 = arith.constant 15 : i32
    %119 = tpu.dynamic_rotate %110 by %c15_i32_35 dim 1 : vector<16x256xf32>, i32 -> vector<16x256xf32>
    %120 = vector.extract_strided_slice %2 {offsets = [2, 0], sizes = [1, 256], strides = [1, 1]} : vector<9x256xf32> to vector<1x256xf32>
    %121 = vector.broadcast %120 : vector<1x256xf32> to vector<16x256xf32>
    %122 = arith.mulf %119, %121 : vector<16x256xf32>
    %c1_i32_36 = arith.constant 1 : i32
    %123 = tpu.dynamic_rotate %110 by %c1_i32_36 dim 1 : vector<16x256xf32>, i32 -> vector<16x256xf32>
    %124 = vector.extract_strided_slice %2 {offsets = [3, 0], sizes = [1, 256], strides = [1, 1]} : vector<9x256xf32> to vector<1x256xf32>
    %125 = vector.broadcast %124 : vector<1x256xf32> to vector<16x256xf32>
    %126 = arith.mulf %123, %125 : vector<16x256xf32>
    %c255_i32_37 = arith.constant 255 : i32
    %127 = tpu.dynamic_rotate %110 by %c255_i32_37 dim 1 : vector<16x256xf32>, i32 -> vector<16x256xf32>
    %128 = vector.extract_strided_slice %2 {offsets = [5, 0], sizes = [1, 256], strides = [1, 1]} : vector<9x256xf32> to vector<1x256xf32>
    %129 = vector.broadcast %128 : vector<1x256xf32> to vector<16x256xf32>
    %130 = arith.mulf %127, %129 : vector<16x256xf32>
    %c241_i32_38 = arith.constant 241 : i32
    %131 = tpu.dynamic_rotate %110 by %c241_i32_38 dim 1 : vector<16x256xf32>, i32 -> vector<16x256xf32>
    %132 = vector.extract_strided_slice %2 {offsets = [6, 0], sizes = [1, 256], strides = [1, 1]} : vector<9x256xf32> to vector<1x256xf32>
    %133 = vector.broadcast %132 : vector<1x256xf32> to vector<16x256xf32>
    %134 = arith.mulf %131, %133 : vector<16x256xf32>
    %c240_i32_39 = arith.constant 240 : i32
    %135 = tpu.dynamic_rotate %110 by %c240_i32_39 dim 1 : vector<16x256xf32>, i32 -> vector<16x256xf32>
    %136 = vector.extract_strided_slice %2 {offsets = [7, 0], sizes = [1, 256], strides = [1, 1]} : vector<9x256xf32> to vector<1x256xf32>
    %137 = vector.broadcast %136 : vector<1x256xf32> to vector<16x256xf32>
    %138 = arith.mulf %135, %137 : vector<16x256xf32>
    %c239_i32_40 = arith.constant 239 : i32
    %139 = tpu.dynamic_rotate %110 by %c239_i32_40 dim 1 : vector<16x256xf32>, i32 -> vector<16x256xf32>
    %140 = vector.extract_strided_slice %2 {offsets = [8, 0], sizes = [1, 256], strides = [1, 1]} : vector<9x256xf32> to vector<1x256xf32>
    %141 = vector.broadcast %140 : vector<1x256xf32> to vector<16x256xf32>
    %142 = arith.mulf %139, %141 : vector<16x256xf32>
    %143 = tpu.concatenate %114, %118, %122, %126, %110, %130, %134, %138, %142 in 0 : vector<16x256xf32>, vector<16x256xf32>, vector<16x256xf32>, vector<16x256xf32>, vector<16x256xf32>, vector<16x256xf32>, vector<16x256xf32>, vector<16x256xf32>, vector<16x256xf32> -> vector<144x256xf32>
    %c0_41 = arith.constant 0 : index
    %c0_42 = arith.constant 0 : index
    %144 = vector.load %arg4[%c0_41, %c0_42] : memref<8x144xf32, #tpu.memory_space<vmem>>, vector<8x144xf32>
    %cst_43 = arith.constant dense<0.000000e+00> : vector<8x256xf32>
    %145 = tpu.matmul %144, %143, %cst_43 {dimension_numbers = #tpu.dot_dimension_numbers<[1], [0], [0], [1], [0, 0, 1, 1], [], []>} : vector<8x144xf32>, vector<144x256xf32>, vector<8x256xf32> -> vector<8x256xf32>
    %146 = arith.addf %1, %145 : vector<8x256xf32>
    %c0_44 = arith.constant 0 : index
    %c0_45 = arith.constant 0 : index
    %147 = vector.load %arg7[%c0_44, %c0_45] : memref<8x4xf32, #tpu.memory_space<vmem>>, vector<8x1xf32>
    %c0_46 = arith.constant 0 : index
    %c1_47 = arith.constant 1 : index
    %148 = vector.load %arg7[%c0_46, %c1_47] : memref<8x4xf32, #tpu.memory_space<vmem>>, vector<8x1xf32>
    %cst_48 = arith.constant dense<0.000000e+00> : vector<8xf32>
    %149 = vector.multi_reduction <add>, %146, %cst_48 [1] : vector<8x256xf32> to vector<8xf32>
    %150 = vector.shape_cast %149 : vector<8xf32> to vector<8x1xf32>
    %151 = arith.mulf %146, %146 : vector<8x256xf32>
    %cst_49 = arith.constant dense<0.000000e+00> : vector<8xf32>
    %152 = vector.multi_reduction <add>, %151, %cst_49 [1] : vector<8x256xf32> to vector<8xf32>
    %153 = vector.shape_cast %152 : vector<8xf32> to vector<8x1xf32>
    %cst_50 = arith.constant 3.906250e-03 : f32
    %154 = vector.broadcast %cst_50 : f32 to vector<8x1xf32>
    %155 = arith.mulf %150, %154 : vector<8x1xf32>
    %cst_51 = arith.constant 3.906250e-03 : f32
    %156 = vector.broadcast %cst_51 : f32 to vector<8x1xf32>
    %157 = arith.mulf %153, %156 : vector<8x1xf32>
    %158 = arith.mulf %155, %155 : vector<8x1xf32>
    %159 = arith.subf %157, %158 : vector<8x1xf32>
    %cst_52 = arith.constant 0.000000e+00 : f32
    %160 = vector.broadcast %cst_52 : f32 to vector<8x1xf32>
    %161 = arith.maximumf %159, %160 : vector<8x1xf32>
    %cst_53 = arith.constant 9.99999974E-6 : f32
    %162 = vector.broadcast %cst_53 : f32 to vector<8x1xf32>
    %163 = arith.addf %161, %162 : vector<8x1xf32>
    %164 = math.rsqrt %163 : vector<8x1xf32>
    %165 = arith.mulf %164, %147 : vector<8x1xf32>
    %166 = arith.mulf %155, %165 : vector<8x1xf32>
    %167 = arith.subf %148, %166 : vector<8x1xf32>
    %168 = vector.broadcast %165 : vector<8x1xf32> to vector<8x256xf32>
    %169 = arith.mulf %146, %168 : vector<8x256xf32>
    %170 = vector.broadcast %167 : vector<8x1xf32> to vector<8x256xf32>
    %171 = arith.addf %169, %170 : vector<8x256xf32>
    %172 = arith.addf %0, %171 : vector<8x256xf32>
    %cst_54 = arith.constant 0.000000e+00 : f32
    %173 = vector.broadcast %cst_54 : f32 to vector<8x256xf32>
    %174 = arith.maximumf %172, %173 : vector<8x256xf32>
    %c0_55 = arith.constant 0 : index
    %c2 = arith.constant 2 : index
    %175 = vector.load %arg7[%c0_55, %c2] : memref<8x4xf32, #tpu.memory_space<vmem>>, vector<8x1xf32>
    %c0_56 = arith.constant 0 : index
    %c3 = arith.constant 3 : index
    %176 = vector.load %arg7[%c0_56, %c3] : memref<8x4xf32, #tpu.memory_space<vmem>>, vector<8x1xf32>
    %cst_57 = arith.constant dense<0.000000e+00> : vector<8xf32>
    %177 = vector.multi_reduction <add>, %174, %cst_57 [1] : vector<8x256xf32> to vector<8xf32>
    %178 = vector.shape_cast %177 : vector<8xf32> to vector<8x1xf32>
    %179 = arith.mulf %174, %174 : vector<8x256xf32>
    %cst_58 = arith.constant dense<0.000000e+00> : vector<8xf32>
    %180 = vector.multi_reduction <add>, %179, %cst_58 [1] : vector<8x256xf32> to vector<8xf32>
    %181 = vector.shape_cast %180 : vector<8xf32> to vector<8x1xf32>
    %cst_59 = arith.constant 3.906250e-03 : f32
    %182 = vector.broadcast %cst_59 : f32 to vector<8x1xf32>
    %183 = arith.mulf %178, %182 : vector<8x1xf32>
    %cst_60 = arith.constant 3.906250e-03 : f32
    %184 = vector.broadcast %cst_60 : f32 to vector<8x1xf32>
    %185 = arith.mulf %181, %184 : vector<8x1xf32>
    %186 = arith.mulf %183, %183 : vector<8x1xf32>
    %187 = arith.subf %185, %186 : vector<8x1xf32>
    %cst_61 = arith.constant 0.000000e+00 : f32
    %188 = vector.broadcast %cst_61 : f32 to vector<8x1xf32>
    %189 = arith.maximumf %187, %188 : vector<8x1xf32>
    %cst_62 = arith.constant 9.99999974E-6 : f32
    %190 = vector.broadcast %cst_62 : f32 to vector<8x1xf32>
    %191 = arith.addf %189, %190 : vector<8x1xf32>
    %192 = math.rsqrt %191 : vector<8x1xf32>
    %193 = arith.mulf %192, %175 : vector<8x1xf32>
    %194 = arith.mulf %183, %193 : vector<8x1xf32>
    %195 = arith.subf %176, %194 : vector<8x1xf32>
    %196 = vector.broadcast %193 : vector<8x1xf32> to vector<8x256xf32>
    %197 = arith.mulf %174, %196 : vector<8x256xf32>
    %198 = vector.broadcast %195 : vector<8x1xf32> to vector<8x256xf32>
    %199 = arith.addf %197, %198 : vector<8x256xf32>
    %c0_63 = arith.constant 0 : index
    %c0_64 = arith.constant 0 : index
    %200 = vector.load %arg8[%c0_63, %c0_64] : memref<8x256xf32, #tpu.memory_space<vmem>>, vector<8x256xf32>
    tpu.vector_store %arg8[%c0_63, %c0_64], %199 {strides = array<i32>} : memref<8x256xf32, #tpu.memory_space<vmem>>, vector<8x256xf32>,
    return
  }
  func.func @transform_0(%arg0: i32) -> (i32, i32) {
    %c0_i32 = arith.constant 0 : i32
    %c0_i32_0 = arith.constant 0 : i32
    return %c0_i32, %arg0 : i32, i32
  }
  func.func @transform_1(%arg0: i32) -> (i32, i32) {
    %c0_i32 = arith.constant 0 : i32
    %c0_i32_0 = arith.constant 0 : i32
    return %c0_i32, %arg0 : i32, i32
  }
  func.func @transform_2(%arg0: i32) -> (i32, i32) {
    %c0_i32 = arith.constant 0 : i32
    %c0_i32_0 = arith.constant 0 : i32
    %c0_i32_1 = arith.constant 0 : i32
    return %c0_i32, %c0_i32_0 : i32, i32
  }
  func.func @transform_3(%arg0: i32) -> (i32, i32) {
    %c0_i32 = arith.constant 0 : i32
    %c0_i32_0 = arith.constant 0 : i32
    %c0_i32_1 = arith.constant 0 : i32
    return %c0_i32, %c0_i32_0 : i32, i32
  }
  func.func @transform_4(%arg0: i32) -> (i32, i32) {
    %c0_i32 = arith.constant 0 : i32
    %c0_i32_0 = arith.constant 0 : i32
    %c0_i32_1 = arith.constant 0 : i32
    return %c0_i32, %c0_i32_0 : i32, i32
  }
  func.func @transform_5(%arg0: i32) -> (i32, i32) {
    %c0_i32 = arith.constant 0 : i32
    %c0_i32_0 = arith.constant 0 : i32
    %c0_i32_1 = arith.constant 0 : i32
    return %c0_i32, %c0_i32_0 : i32, i32
  }
  func.func @transform_6(%arg0: i32) -> (i32, i32) {
    %c0_i32 = arith.constant 0 : i32
    %c0_i32_0 = arith.constant 0 : i32
    %c0_i32_1 = arith.constant 0 : i32
    return %c0_i32, %c0_i32_0 : i32, i32
  }
  func.func @transform_7(%arg0: i32) -> (i32, i32) {
    %c0_i32 = arith.constant 0 : i32
    %c0_i32_0 = arith.constant 0 : i32
    return %c0_i32, %arg0 : i32, i32
  }
}

</mosaic_0001>

<bundles_post_ra>
// kernel: tpu_custom_call.1
= control target key start
LH: loop header
LB: loop body
LE: loop exit
PB: predicated region body
PF: predicated region fallthrough
CT: control target
= control target key end

     0   :  { %s2094_s0 = inlined_call_operand.hbm [shape: f32[8,512], index: 0, kind: input, shape index: {}]   ;;  %s2095_s1 = inlined_call_operand.hbm [shape: f32[8,512], index: 1, kind: input, shape index: {}]   ;;  %s2096_s2 = inlined_call_operand.hbm [shape: f32[16,72], index: 2, kind: input, shape index: {}]   ;;  %s2097_s3 = inlined_call_operand.hbm [shape: f32[8,144], index: 3, kind: input, shape index: {}]   ;;  %s2098_s4 = inlined_call_operand.vmem [shape: f32[9,256], index: 4, kind: input, shape index: {}]   ;;  %s2099_s5 = inlined_call_operand.vmem [shape: f32[16,2], index: 5, kind: input, shape index: {}]   ;;  %s2100_s6 = inlined_call_operand.vmem [shape: f32[8,4], index: 6, kind: input, shape index: {}]   ;;  %s2101_s7 = inlined_call_operand.hbm [shape: f32[8,512], index: 7, kind: output, shape index: {}]  }
   0x1   :  { %2106 = sst [smem:[#allocation20_spill]] %s2096_s2 }
   0x2   :  { %2107 = sst [smem:[#allocation21_spill]] %s2097_s3 }
   0x3   :  { %12 = vsyncpa [#allocation3], 0 }
   0x4   :  { %14 = vsyncpa [#allocation3 + $0x1], 0 }
   0x5   :  { %15 = vsyncpa [#allocation6], 0 }
   0x6   :  { %17 = vsyncpa [#allocation6 + $0x1], 0 }
   0x7   :  { %18 = vsyncpa [#allocation9], 0 }
   0x8   :  { %19 = vsyncpa [#allocation4], 0 }
   0x9   :  { %21 = vsyncpa [#allocation4 + $0x1], 0  ;;  %s1508_s24 = smov 0   ;;  %s1510_s25 = smov 0  }
   0xa   :  { %s1512_s26 = smov 0   ;;  %s1514_s27 = smov 0  }
   0xb LB: > { %2108 = sst [smem:[#allocation16_spill]] %s1446_s26  ;;  %s1532_s8 = sadd.s32 4294967295, %s1450_s27   ;;  %s1450_s27 = sphi %s1514_s27, %s2126_s27   ;;  %s1446_s26 = sphi %s1512_s26, %s2128_s26   ;;  %s1442_s25 = sphi %s1510_s25, %s2130_s25   ;;  %s1438_s24 = sphi %s1508_s24, %s2129_s24  }
   0xc   : > { %2109 = sst [smem:[#allocation17_spill]] %s1450_s27  ;;  %p1118_p0 = scmp.ge.s32.totalorder %s1450_s27, 1 }
   0xd   : > { %s2110_s2 = sld [smem:[#allocation20_spill]]  ;;  %p48_p1 = scmp.eq.s32.totalorder %s1532_s8, 0 }
   0xe   : > { %p215_p2 = scmp.lt.s32.totalorder %s1450_s27, 3  ;;  %s1452_s10 = smov [#allocation7]  }
   0xf   : > { %s228_s11 = sshll.u32 %s1452_s10, 4  ;;  %s2112_s3 = sld [smem:[#allocation21_spill]]  ;;  %s229_s11 = int_to_ptr.vmem [resolvable:$true] %s228_s11 }
  0x10   : > { %p1537_p3 = pnand %p1118_p0, %p215_p2  ;;  %s1453_s15 = smov [#allocation8]  }
  0x11   : > { %s243_s16 = sshll.u32 %s1453_s15, 4  ;;  %s1454_s17 = smov 128   ;;  %s244_s16 = int_to_ptr.vmem [resolvable:$true] %s243_s16 }
  0x12   : > { %p1162_p4 = pneg %p1537_p3  ;;  %s1455_s18 = smov 8  }
  0x13   : > { %s226_s30 = sshll.u32 %s2110_s2, 4  ;;  %s1117_s19 = sadd.s32 4294967294, %s1450_s27   ;;  %s227_s30 = int_to_ptr.hbm [resolvable:$true] %s226_s30 }
  0x14   : > { %p1163_p6 = pnand %p1162_p4, %p48_p1  ;;  %s1551_s20 = sadd.s32 1, %s1450_s27  }
  0x15   : > { %s241_s14 = sshll.u32 %s2112_s3, 4  ;;  %2113 = sst [smem:[#allocation18_spill]] %s1551_s20  ;;  %s242_s14 = int_to_ptr.hbm [resolvable:$true] %s241_s14 }
  0x16   : > { %1165 = dma.hbm_to_vmem [thread:$0]  (!%p1163_p6), %s227_s30, 256, %s229_s11, [#allocation6], %s1454_s17, %s1454_s17, %s1455_s18  }
  0x17   : > { %1168 = dma.hbm_to_vmem [thread:$0]  (!%p1163_p6), %s242_s14, 256, %s244_s16, [#allocation9]  }
  0x18   : > { %s31_s21 = ssub.s32 %s1450_s27, %s1551_s20  ;;  %s34_s22 = sadd.s32 1, %s1446_s26 }
  0x19   : > { %p32_p7 = scmp.eq.s32.totalorder %s31_s21, 0  ;;  %p41_p8 = scmp.ne.s32.totalorder %s1446_s26, %s1442_s25 }
  0x1a   : > { %p42_p9 = scmp.eq.s32.totalorder %s1450_s27, 0  ;;  %p47_p10 = scmp.ne.s32.totalorder %s1442_s25, %s1438_s24 }
  0x1b   : > { %s1562_s23 = scalar_select %p32_p7, %s1446_s26, %s34_s22  }
  0x1c   : > { %p1564_p11 = por %p42_p9, %p41_p8  ;;  %p1570_p12 = por %p48_p1, %p47_p10 }
  0x1d   : > { %2114 = sst [smem:[#allocation19_spill]] %s1562_s23  ;;  %p202_p13 = scmp.eq.s32.totalorder %s1532_s8, 1 }
  0x1e   : > { %p208_p0 = scmp.eq.s32.totalorder %s1117_s19, 1  ;;  %p1182_p2 = scmp.lt.s32.totalorder %s1450_s27, 2 }
  0x1f   : > { %s263_s30 = sand.u32 1, %s1446_s26   ;;  %p1577_p4 = por %p202_p13, %p41_p8 }
  0x20   : > { %p1581_p6 = por %p208_p0, %p47_p10  ;;  %s1585_s12 = sshll.u32 %s263_s30, 4 }
  0x21   : > { %s1145_s13 = sshll.u32 %s1450_s27, 4  ;;  %s267_s17 = scalar_lea.vmem [#allocation2], %s1585_s12 }
  0x22   : > { %s272_s16 = scalar_lea.hbm %s2094_s0, %s1145_s13  ;;  %s276_s18 = sshll.u32 %s267_s17, 4  ;;  %s277_s18 = int_to_ptr.vmem [resolvable:$true] %s276_s18 }
  0x23   : > { %s274_s19 = sshll.u32 %s272_s16, 4  ;;  %p1594_p7 = pnand %p1182_p2, %p1564_p11  ;;  %s275_s19 = int_to_ptr.hbm [resolvable:$true] %s274_s19 }
  0x24   : > { %s292_s3 = scalar_lea.hbm %s2095_s1, %s1145_s13  ;;  %s283_s23 = sand.u32 1, %s1450_s27  }
  0x25   : > { %s264_s26 = scalar_lea.sflag [#allocation3], %s263_s30  ;;  %s1312_s14 = sshra.s32 %s275_s19, 4  ;;  %s1313_s14 = int_to_ptr.hbm [resolvable:$true] %s1312_s14 }
  0x26   : > { %s1314_s15 = scalar_lea.hbm %s1313_s14, 16  ;;  %p1316_p9 = pneg %p1594_p7 }
  0x27   : > { %p1315_p8 = scmp.ne.s32.totalorder %s1313_s14, %s1314_s15  ;;  %s1319_s17 = scalar_lea.hbm %s2094_s0, 32 }
  0x28   : > { %p1320_p13 = scmp.lt.s32.totalorder %s1313_s14, %s2094_s0  ;;  %p1321_p0 = scmp.lt.s32.totalorder %s1319_s17, %s1314_s15 }
  0x29   : > { %p1317_p10 = pnand %p1316_p9, %p1315_p8 }
  0x2a   : > { %p1322_p2 = por %p1321_p0, %p1320_p13 }
  0x2b   : > { %p1318_p11 = pneg %p1317_p10 }
  0x2d   : > { %p1323_p5 = pnand %p1322_p2, %p1318_p11 }
  0x2f   : > { %1326 = shalt.err (!%p1323_p5)
}
  0x30   : > { %1172 = dma.hbm_to_vmem [thread:$0]  (!%p1594_p7), %s275_s19, 256, %s277_s18, %s264_s26  }
  0x31   : > { %s294_s30 = sshll.u32 %s292_s3, 4  ;;  %s287_s13 = scalar_lea.vmem [#allocation5], %s1585_s12  ;;  %s295_s30 = int_to_ptr.hbm [resolvable:$true] %s294_s30 }
  0x32   : > { %s296_s20 = sshll.u32 %s287_s13, 4  ;;  %s284_s28 = scalar_lea.sflag [#allocation6], %s283_s23  ;;  %s297_s20 = int_to_ptr.vmem [resolvable:$true] %s296_s20 }
  0x33   : > { %s1342_s16 = sshra.s32 %s295_s30, 4  ;;  %s1349_s17 = scalar_lea.hbm %s2095_s1, 32  ;;  %s1343_s16 = int_to_ptr.hbm [resolvable:$true] %s1342_s16 }
  0x34   : > { %s1344_s27 = scalar_lea.hbm %s1343_s16, 16  ;;  %p1350_p5 = scmp.lt.s32.totalorder %s1343_s16, %s2095_s1 }
  0x35   : > { %p1345_p8 = scmp.ne.s32.totalorder %s1343_s16, %s1344_s27  ;;  %p1351_p13 = scmp.lt.s32.totalorder %s1349_s17, %s1344_s27 }
  0x37   : > { %p1347_p10 = pnand %p1345_p8, %p1316_p9  ;;  %p1352_p0 = por %p1351_p13, %p1350_p5 }
  0x39   : > { %p1348_p11 = pneg %p1347_p10 }
  0x3b   : > { %p1353_p2 = pnand %p1352_p0, %p1348_p11 }
  0x3d   : > { %1356 = shalt.err (!%p1353_p2)
}
  0x3e   : > { %1175 = dma.hbm_to_vmem [thread:$0]  (!%p1594_p7), %s295_s30, 256, %s297_s20, %s284_s28  }
  0x3f   : > { %305 = sbr.rel (%p1537_p3) target bundleno = 1849 (0x739), region = 48  ;;  %s1630_s3 = sand.u32 (!%p1537_p3), 1, %s1442_s25  }
  0x40   : > { %s1633_s23 = sshll.u32 (!%p1537_p3), %s1630_s3, 4  ;;  %s308_s12 = scalar_lea.sflag (!%p1537_p3), [#allocation3], %s1630_s3 }
  0x41   : > { %s311_s27 = scalar_lea.vmem (!%p1537_p3), [#allocation2], %s1633_s23 }
  0x44   : > { %1417 = dma.done.wait (%p1570_p12), %s308_s12, 256  }
  0x45   : > { %1419 = vsyncadd (%p1570_p12), %s308_s12, 4294967040  ;;  %s317_s9 = sand.u32 1, %s1532_s8   ;;  %s321_s18 = scalar_lea.vmem [#allocation5], %s1633_s23 }
  0x46   : > { %s318_s20 = scalar_lea.sflag [#allocation6], %s317_s9 }
  0x47   : > { %1421 = dma.done.wait (%p1570_p12), %s318_s20, 256  }
  0x48   : > { %1423 = vsyncadd (%p1570_p12), %s318_s20, 4294967040 }
  0x49   : > { %1425 = dma.done.wait (%p48_p1), [#allocation6], 256  }
  0x4a   : > { %1427 = vsyncadd (%p48_p1), [#allocation6], 4294967040 }
  0x4b   : > { %1429 = dma.done.wait (%p48_p1), [#allocation9], 256  }
  0x4c   : > { %1431 = vsyncadd (%p48_p1), [#allocation9], 4294967040  ;;  %v1655_v0 = vld [vmem:[%s311_s27] sm:$0xff]  ;;  %s1456_s19 = smov 112   ;;  %s1457_s29 = smov 111   ;;  %v1663_v1 = vld [vmem:[%s311_s27 + $0x8] sm:$0xff]  ;;  %v383_v3 = vlaneseq }
  0x4d   : > { %447 = vrot.lane.b32.xlu1 %v1655_v0, %s1456_s19  ;;  %458 = vrot.lane.b32.xlu0 %v1655_v0, %s1457_s29  ;;  %s1458_s21 = smov 113   ;;  %s1459_s22 = smov 127   ;;  %v1697_v8 = vld [vmem:[%s2098_s4] sm:$0xff]  ;;  %v1702_v9 = vld [vmem:[%s2098_s4 + $0x8] sm:$0xff]  ;;  %vm471_vm8 = vcmask 588800  }
  0x4e   : > { %436 = vrot.lane.b32.xlu2 %v1655_v0, %s1458_s21  ;;  %s1460_s30 = smov 1   ;;  %s1461_s13 = smov 15   ;;  %v1692_v6 = vand.u32 127, %v383_v3  ;;  %v1709_v10 = vld [vmem:[%s2098_s4 + $0x10] ss:$0 sm:$0xff]  ;;  %v1718_v14 = vperm.slane %v1697_v8, 7 }
  0x4f   : > { %s1462_s28 = smov 16   ;;  %s1463_s16 = smov 17   ;;  %v1714_v11 = vld [vmem:[%s2098_s4 + $0x18] ss:$0 sm:$0xff]  ;;  %v1721_v15 = vperm.slane %v1702_v9, 7  ;;  %v1734_v22 = vperm.slane %v1697_v8, 6 }
  0x50   : > { %vm451_vm0 = vcmp.lt.s32.totalorder %v1692_v6, 112  ;;  %vm462_vm1 = vcmp.lt.s32.totalorder %v1692_v6, 111  ;;  %vm440_vm2 = vcmp.lt.s32.totalorder %v1692_v6, 113  ;;  %v1737_v23 = vperm.slane %v1702_v9, 6 }
  0x51   : > { %vm429_vm3 = vcmp.lt.s32.totalorder %v1692_v6, 127  ;;  %v1749_v31 = vperm.slane %v1697_v8, 5  ;;  %v1752_v32 = vperm.slane %v1702_v9, 5  ;;  %vm418_vm4 = vcmp.lt.s32.totalorder %v1692_v6, 1 }
  0x52   : > { %v1762_v39 = vperm.slane %v1697_v8, 3  ;;  %v1767_v40 = vperm.slane %v1702_v9, 3  ;;  %vm407_vm5 = vcmp.lt.s32.totalorder %v1692_v6, 15  ;;  %v1771_v42 = vperm.slane %v1697_v8, 2 }
  0x53   : > { %v1774_v43 = vperm.slane %v1702_v9, 2  ;;  %vm396_vm6 = vcmp.lt.s32.totalorder %v1692_v6, 16  ;;  %v1790_v54 = vperm.slane %v1697_v8, 1  ;;  %v1793_v55 = vperm.slane %v1702_v9, 1 }
  0x54   : > { %vm385_vm7 = vcmp.lt.s32.totalorder %v1692_v6, 17  ;;  %v1803_v63 = vperm.slane %v1697_v8, 0  ;;  %v470_v8 = vld [vmem:[#allocation7 + $0x8] sm:$0xff] }
  0x55   : > { %449 = vrot.lane.b32.xlu1 %v1663_v1, %s1456_s19  ;;  %460 = vrot.lane.b32.xlu0 %v1663_v1, %s1457_s29 }
  0x56   : > { %438 = vrot.lane.b32.xlu2 %v1663_v1, %s1458_s21 }
  0x5d   : > { %427 = vrot.lane.b32.xlu1 %v1663_v1, %s1459_s22  ;;  %425 = vrot.lane.b32.xlu0 %v1655_v0, %s1459_s22 }
  0x5e   : > { %414 = vrot.lane.b32.xlu2 %v1655_v0, %s1460_s30 }
  0x65   : > { %403 = vrot.lane.b32.xlu1 %v1655_v0, %s1461_s13  ;;  %416 = vrot.lane.b32.xlu0 %v1663_v1, %s1460_s30 }
  0x66   : > { %405 = vrot.lane.b32.xlu2 %v1663_v1, %s1461_s13 }
  0x6d   : > { %394 = vrot.lane.b32.xlu1 %v1663_v1, %s1462_s28  ;;  %392 = vrot.lane.b32.xlu0 %v1655_v0, %s1462_s28 }
  0x6e   : > { %379 = vrot.lane.b32.xlu2 %v1655_v0, %s1463_s16 }
  0x75   : > { %381 = vrot.lane.b32.xlu0 %v1663_v1, %s1463_s16 }
  0xa8   : > { %v437_v2 = vpop.permute.xlu2 %436 }
  0xb0   : > { %v439_v7 = vpop.permute.xlu2 %438 }
  0xb1   : > { %v441_v24 = vsel %vm440_vm2, %v437_v2, %v439_v7  ;;  %v442_v25 = vsel %vm440_vm2, %v439_v7, %v437_v2  ;;  %v1806_v2 = vperm.slane %v1702_v9, 0 }
  0xb2   : > { %v445_v29 = vmul.f32 %v1734_v22, %v441_v24  ;;  %v446_v30 = vmul.f32 %v1737_v23, %v442_v25 }
  0xb8   : > { %v415_v28 = vpop.permute.xlu2 %414 }
  0xbf   : > { %v448_v4 = vpop.permute.xlu1 %447  ;;  %v459_v5 = vpop.permute.xlu0 %458 }
  0xc0   : > { %v406_v41 = vpop.permute.xlu2 %405 }
  0xc7   : > { %v450_v12 = vpop.permute.xlu1 %449  ;;  %v461_v13 = vpop.permute.xlu0 %460 }
  0xc8   : > { %v452_v16 = vsel %vm451_vm0, %v448_v4, %v450_v12  ;;  %v453_v17 = vsel %vm451_vm0, %v450_v12, %v448_v4  ;;  %v463_v18 = vsel %vm462_vm1, %v459_v5, %v461_v13  ;;  %v464_v19 = vsel %vm462_vm1, %v461_v13, %v459_v5  ;;  %v380_v62 = vpop.permute.xlu2 %379 }
  0xc9   : > { %v467_v20 = vmul.f32 %v1709_v10, %v463_v18  ;;  %v468_v21 = vmul.f32 %v1714_v11, %v464_v19  ;;  %v456_v26 = vmul.f32 %v1718_v14, %v452_v16  ;;  %v457_v27 = vmul.f32 %v1721_v15, %v453_v17  ;;  %v469_v16 = vld [vmem:[#allocation7] sm:$0xff] }
  0xcb   : > { %485 = vmatpush.msra.mxu0 %v467_v20  ;;  %508 = vmatpush.msra.mxu1 %v468_v21 }
  0xcd   : > { %486 = vmatpush.msra.mxu0 %v456_v26  ;;  %509 = vmatpush.msra.mxu1 %v457_v27 }
  0xcf   : > { %v428_v33 = vpop.permute.xlu1 %427  ;;  %487 = vmatpush.msra.mxu0 %v445_v29  ;;  %510 = vmatpush.msra.mxu1 %v446_v30  ;;  %v426_v34 = vpop.permute.xlu0 %425 }
  0xd0   : > { %v430_v35 = vsel %vm429_vm3, %v426_v34, %v428_v33  ;;  %v431_v36 = vsel %vm429_vm3, %v428_v33, %v426_v34 }
  0xd1   : > { %v434_v37 = vmul.f32 %v1749_v31, %v430_v35  ;;  %v435_v38 = vmul.f32 %v1752_v32, %v431_v36  ;;  %v547_v36 = vshrl.u32 %v383_v3, 7 }
  0xd3   : > { %488 = vmatpush.msra.mxu0 %v434_v37  ;;  %511 = vmatpush.msra.mxu1 %v435_v38  ;;  %v548_v37 = vadd.s32 8, %v547_v36  ;;  %vm575_vm9 = vcmp.lt.s32.totalorder %v547_v36, 7  ;;  %vm580_vm10 = vcmp.lt.s32.totalorder %v547_v36, 1 }
  0xd5   : > { %489 = vmatpush.msra.mxu0 %v1655_v0  ;;  %512 = vmatpush.msra.mxu1 %v1663_v1  ;;  %v560_v38 = vand.u32 1, %v548_v37 }
  0xd7   : > { %v404_v44 = vpop.permute.xlu1 %403  ;;  %v417_v45 = vpop.permute.xlu0 %416  ;;  %vm1837_vm11 = vcmp.lt.s32.totalorder %v560_v38, 1 }
  0xd8   : > { %v419_v46 = vsel %vm418_vm4, %v415_v28, %v417_v45  ;;  %v420_v47 = vsel %vm418_vm4, %v417_v45, %v415_v28  ;;  %v408_v48 = vsel %vm407_vm5, %v404_v44, %v406_v41  ;;  %v409_v49 = vsel %vm407_vm5, %v406_v41, %v404_v44 }
  0xd9   : > { %v423_v50 = vmul.f32 %v1762_v39, %v420_v47  ;;  %v424_v51 = vmul.f32 %v1767_v40, %v419_v46  ;;  %v412_v52 = vmul.f32 %v1771_v42, %v409_v49  ;;  %v413_v53 = vmul.f32 %v1774_v43, %v408_v48 }
  0xda   : > { %v553_v41 = vand.u32 1, %v547_v36  ;;  %v1464_v45 = vmov 0  }
  0xdb   : > { %490 = vmatpush.msra.mxu0 %v423_v50  ;;  %513 = vmatpush.msra.mxu1 %v424_v51 }
  0xdc   : > { %1234 = vset.pattern.permute.xlu0 %v1464_v45  ;;  %1235 = vset.pattern.permute.xlu1 %v1464_v45  ;;  %vm1841_vm12 = vcmp.lt.s32.totalorder %v553_v41, 1 }
  0xdd   : > { %491 = vmatpush.msra.mxu0 %v412_v52  ;;  %514 = vmatpush.msra.mxu1 %v413_v53 }
  0xdf   : > { %v395_v56 = vpop.permute.xlu1 %394  ;;  %v393_v57 = vpop.permute.xlu0 %392 }
  0xe0   : > { %v397_v58 = vsel %vm396_vm6, %v393_v57, %v395_v56  ;;  %v398_v59 = vsel %vm396_vm6, %v395_v56, %v393_v57 }
  0xe1   : > { %v401_v60 = vmul.f32 %v1790_v54, %v398_v59  ;;  %v402_v61 = vmul.f32 %v1793_v55, %v397_v58 }
  0xe3   : > { %492 = vmatpush.msra.mxu0 %v401_v60  ;;  %515 = vmatpush.msra.mxu1 %v402_v61 }
  0xe7   : > { %v382_v4 = vpop.permute.xlu0 %381 }
  0xe8   : > { %v386_v5 = vsel %vm385_vm7, %v380_v62, %v382_v4  ;;  %v387_v7 = vsel %vm385_vm7, %v382_v4, %v380_v62 }
  0xe9   : > { %v390_v12 = vmul.f32 %v1803_v63, %v387_v7  ;;  %v391_v13 = vmul.f32 %v1806_v2, %v386_v5 }
  0xeb   : > { %493 = vmatpush.msra.mxu0 %v390_v12  ;;  %516 = vmatpush.msra.mxu1 %v391_v13 }
  0xec   : > { %1134 = vmatmul.msk.f32.vlgmr.msra.gmra.mxu0 %vm471_vm8, %v469_v16  ;;  %1136 = vmatmul.msk.f32.vlgmr.msra.gmra.mxu1 %vm471_vm8, %v469_v16 }
  0xf4   : > { %1135 = vmatmul.msk.f32.gmra.mxu0 %vm471_vm8, %v470_v8  ;;  %1137 = vmatmul.msk.f32.gmra.mxu1 %vm471_vm8, %v470_v8 }
 0x169   : > { %v495_v9 = vpop.f32.mrf.mxu0  ;;  %v518_v17 = vpop.f32.mrf.mxu1 }
 0x16a   : > { %v1814_v18 = vmax.f32 %v495_v9, 0.0  ;;  %v1816_v19 = vmax.f32 %v518_v17, 0.0 }
 0x16c   : > { %v530_v20 = vadd.f32 %v1816_v19, %v1814_v18  ;;  %v536_v21 = vmul.f32 %v1814_v18, %v1814_v18  ;;  %v537_v24 = vmul.f32 %v1816_v19, %v1816_v19 }
 0x16e   : > { %531 = vadd.xlane.f32.xlu1 %v530_v20  ;;  %v540_v25 = vadd.f32 %v537_v24, %v536_v21 }
 0x170   : > { %541 = vadd.xlane.f32.xlu0 %v540_v25 }
 0x171   : > { %v498_v26 = vpop.f32.mrf.mxu0  ;;  %v521_v27 = vpop.f32.mrf.mxu1 }
 0x172   : > { %v1824_v28 = vmax.f32 %v498_v26, 0.0  ;;  %v1826_v29 = vmax.f32 %v521_v27, 0.0 }
 0x174   : > { %v533_v30 = vadd.f32 %v1826_v29, %v1824_v28  ;;  %v538_v33 = vmul.f32 %v1824_v28, %v1824_v28  ;;  %v539_v34 = vmul.f32 %v1826_v29, %v1826_v29 }
 0x176   : > { %534 = vadd.xlane.f32.xlu2 %v533_v30  ;;  %v543_v35 = vadd.f32 %v539_v34, %v538_v33 }
 0x17e   : > { %544 = vadd.xlane.f32.xlu2 %v543_v35 }
 0x1e1   : > { %v532_v44 = vpop.xlane.xlu1 %531 }
 0x1e2   : > { %v573_v3 = vrot.slane %v532_v44, 1  ;;  %v578_v49 = vrot.slane %v532_v44, 7 }
 0x1e3   : > { %v542_v60 = vpop.xlane.xlu0 %541 }
 0x1e4   : > { %v591_v5 = vrot.slane %v542_v60, 1  ;;  %v595_v7 = vrot.slane %v542_v60, 7 }
 0x1e9   : > { %v535_v47 = vpop.xlane.xlu2 %534 }
 0x1ea   : > { %v574_v50 = vrot.slane %v535_v47, 1  ;;  %v579_v51 = vrot.slane %v535_v47, 7 }
 0x1ec   : > { %v576_v52 = vsel %vm575_vm9, %v573_v3, %v574_v50  ;;  %v577_v53 = vsel %vm575_vm9, %v574_v50, %v573_v3  ;;  %v581_v56 = vsel %vm580_vm10, %v578_v49, %v579_v51  ;;  %v582_v57 = vsel %vm580_vm10, %v579_v51, %v578_v49 }
 0x1ed   : > { %v586_v58 = vsel %vm1837_vm11, %v577_v53, %v581_v56  ;;  %v585_v59 = vsel %vm1841_vm12, %v576_v52, %v582_v57 }
 0x1ee   : > { %v588_v61 = vadd.f32 %v586_v58, %v535_v47  ;;  %v587_v62 = vadd.f32 %v585_v59, %v532_v44  ;;  %v529_v58 = vld [vmem:[%s2099_s5 + $0x8] sm:$0xff] }
 0x1f0   : > { %v590_v16 = vmul.f32 0.001953125, %v588_v61  ;;  %v589_v8 = vmul.f32 0.001953125, %v587_v62 }
 0x1f1   : > { %v545_v4 = vpop.xlane.xlu2 %544 }
 0x1f2   : > { %v592_v12 = vrot.slane %v545_v4, 1  ;;  %v596_v13 = vrot.slane %v545_v4, 7  ;;  %v606_v30 = vmul.f32 %v590_v16, %v590_v16  ;;  %v605_v35 = vmul.f32 %v589_v8, %v589_v8 }
 0x1f4   : > { %v593_v9 = vsel %vm575_vm9, %v591_v5, %v592_v12  ;;  %v594_v17 = vsel %vm575_vm9, %v592_v12, %v591_v5  ;;  %v597_v20 = vsel %vm580_vm10, %v595_v7, %v596_v13  ;;  %v598_v21 = vsel %vm580_vm10, %v596_v13, %v595_v7 }
 0x1f5   : > { %v600_v24 = vsel %vm1837_vm11, %v594_v17, %v597_v20  ;;  %v599_v25 = vsel %vm1841_vm12, %v593_v9, %v598_v21  ;;  %v1465_v9 = vmov 1  }
 0x1f6   : > { %v602_v26 = vadd.f32 %v600_v24, %v545_v4  ;;  %v601_v27 = vadd.f32 %v599_v25, %v542_v60  ;;  %v528_v60 = vld [vmem:[%s2099_s5] sm:$0xff]  ;;  %1236 = vset.pattern.permute.xlu2 %v1465_v9 }
 0x1f8   : > { %v604_v33 = vmul.f32 0.001953125, %v602_v26  ;;  %v603_v34 = vmul.f32 0.001953125, %v601_v27 }
 0x1fa   : > { %v608_v37 = vsub.f32 %v604_v33, %v606_v30  ;;  %v607_v38 = vsub.f32 %v603_v34, %v605_v35 }
 0x1fc   : > { %v610_v41 = vmax.f32 %v608_v37, 0.0  ;;  %v609_v44 = vmax.f32 %v607_v38, 0.0 }
 0x1fe   : > { %v612_v47 = vadd.f32 1e-05, %v610_v41  ;;  %v611_v3 = vadd.f32 1e-05, %v609_v44 }
 0x200   : > { %1244 = vrsqrt.f32 %v612_v47  ;;  %vm629_vm15 = vweird.f32 %v612_v47  ;;  %vm619_vm9 = vweird.f32 %v611_v3 }
 0x201   : > { %1246 = vrsqrt.f32 %v611_v3 }
 0x206   : > { %v1245_v36 = vpop.eup %1244 }
 0x207   : > { %v1247_v46 = vpop.eup %1246  ;;  %v624_v49 = vmul.f32 %v1245_v36, %v612_v47  ;;  %vm630_vm13 = vweird.f32 %v1245_v36 }
 0x208   : > { %v614_v50 = vmul.f32 %v1247_v46, %v611_v3  ;;  %vm620_vm14 = vweird.f32 %v1247_v46  ;;  %vm631_vm8 = vmor %vm629_vm15, %vm630_vm13 }
 0x209   : > { %v625_v48 = vmul.f32 %v1245_v36, %v624_v49  ;;  %vm621_vm10 = vmor %vm619_vm9, %vm620_vm14 }
 0x20a   : > { %v615_v51 = vmul.f32 %v1247_v46, %v614_v50 }
 0x20b   : > { %v626_v52 = vmul.f32 0.5, %v625_v48 }
 0x20c   : > { %v616_v53 = vmul.f32 0.5, %v615_v51 }
 0x20d   : > { %v627_v56 = vsub.f32 1.5, %v626_v52 }
 0x20e   : > { %v617_v57 = vsub.f32 1.5, %v616_v53 }
 0x20f   : > { %v628_v59 = vmul.f32 %v1245_v36, %v627_v56 }
 0x210   : > { %v618_v61 = vmul.f32 %v1247_v46, %v617_v57 }
 0x211   : > { %v632_v62 = vsel %vm631_vm8, %v1245_v36, %v628_v59 }
 0x212   : > { %v634_v4 = vmul.f32 %v632_v62, %v529_v58  ;;  %v622_v5 = vsel %vm621_vm10, %v1247_v46, %v618_v61 }
 0x213   : > { %v633_v7 = vmul.f32 %v622_v5, %v528_v60 }
 0x214   : > { %654 = vperm.xlu0 %1234, %v634_v4   ;;  %v636_v12 = vmul.f32 %v634_v4, %v590_v16 }
 0x215   : > { %v635_v13 = vmul.f32 %v633_v7, %v589_v8 }
 0x216   : > { %641 = vrot.lane.b32.xlu1 %v636_v12, %s1460_s30 }
 0x217   : > { %639 = vrot.lane.b32.xlu2 %v635_v13, %s1460_s30 }
 0x21e   : > { %649 = vperm.xlu1 %1235, %v633_v7  }
 0x226   : > { %1237 = vset.pattern.permute.xlu1 %v1465_v9 }
 0x271   : > { %v640_v17 = vpop.permute.xlu2 %639 }
 0x272   : > { %v645_v20 = vsub.f32 %v528_v60, %v640_v17 }
 0x274   : > { %663 = vperm.xlu1 %1237, %v645_v20  }
 0x27c   : > { %1238 = vset.pattern.permute.xlu1 %v1464_v45 }
 0x286   : > { %v655_v8 = vpop.permute.xlu0 %654 }
 0x287   : > { %v659_v25 = vmul.f32 %v655_v8, %v1824_v28  ;;  %v660_v26 = vmul.f32 %v655_v8, %v1826_v29 }
 0x288   : > { %v642_v21 = vpop.permute.xlu1 %641 }
 0x289   : > { %v646_v24 = vsub.f32 %v529_v58, %v642_v21 }
 0x28b   : > { %668 = vperm.xlu2 %1236, %v646_v24  }
 0x290   : > { %v650_v16 = vpop.permute.xlu1 %649 }
 0x291   : > { %v658_v27 = vmul.f32 %v650_v16, %v1816_v19  ;;  %v657_v28 = vmul.f32 %v650_v16, %v1814_v18 }
 0x2e5   : > { %v669_v30 = vpop.permute.xlu2 %668 }
 0x2e6   : > { %v664_v33 = vpop.permute.xlu1 %663  ;;  %v1875_v34 = vadd.f32 %v669_v30, %v659_v25  ;;  %v1877_v35 = vadd.f32 %v669_v30, %v660_v26 }
 0x2e7   : > { %v1879_v37 = vadd.f32 %v664_v33, %v658_v27  ;;  %v1888_v19 = vadd.f32 %v664_v33, %v657_v28 }
 0x2e8   : > { %777 = vrot.lane.b32.xlu1 %v1877_v35, %s1456_s19  ;;  %773 = vrot.lane.b32.xlu2 %v1875_v34, %s1456_s19 }
 0x2e9   : > { %775 = vrot.lane.b32.xlu0 %v1879_v37, %s1456_s19 }
 0x2f0   : > { %757 = vrot.lane.b32.xlu1 %v1875_v34, %s1458_s21  ;;  %771 = vrot.lane.b32.xlu2 %v1888_v19, %s1456_s19 }
 0x2f1   : > { %755 = vrot.lane.b32.xlu0 %v1888_v19, %s1458_s21 }
 0x2f8   : > { %759 = vrot.lane.b32.xlu1 %v1879_v37, %s1458_s21  ;;  %761 = vrot.lane.b32.xlu2 %v1877_v35, %s1458_s21 }
 0x2f9   : > { %745 = vrot.lane.b32.xlu0 %v1877_v35, %s1459_s22 }
 0x300   : > { %739 = vrot.lane.b32.xlu1 %v1888_v19, %s1459_s22  ;;  %741 = vrot.lane.b32.xlu2 %v1875_v34, %s1459_s22 }
 0x301   : > { %725 = vrot.lane.b32.xlu0 %v1875_v34, %s1460_s30 }
 0x308   : > { %729 = vrot.lane.b32.xlu1 %v1877_v35, %s1460_s30  ;;  %743 = vrot.lane.b32.xlu2 %v1879_v37, %s1459_s22 }
 0x309   : > { %727 = vrot.lane.b32.xlu0 %v1879_v37, %s1460_s30 }
 0x310   : > { %709 = vrot.lane.b32.xlu1 %v1875_v34, %s1461_s13  ;;  %723 = vrot.lane.b32.xlu2 %v1888_v19, %s1460_s30 }
 0x311   : > { %707 = vrot.lane.b32.xlu0 %v1888_v19, %s1461_s13 }
 0x318   : > { %711 = vrot.lane.b32.xlu1 %v1879_v37, %s1461_s13  ;;  %713 = vrot.lane.b32.xlu2 %v1877_v35, %s1461_s13 }
 0x319   : > { %697 = vrot.lane.b32.xlu0 %v1877_v35, %s1462_s28 }
 0x320   : > { %691 = vrot.lane.b32.xlu1 %v1888_v19, %s1462_s28  ;;  %693 = vrot.lane.b32.xlu2 %v1875_v34, %s1462_s28 }
 0x321   : > { %677 = vrot.lane.b32.xlu0 %v1875_v34, %s1463_s16 }
 0x328   : > { %681 = vrot.lane.b32.xlu1 %v1877_v35, %s1463_s16  ;;  %695 = vrot.lane.b32.xlu2 %v1879_v37, %s1462_s28  ;;  %s367_s28 = scalar_lea.vmem [#allocation10], %s1633_s23  ;;  %s1392_s23 = scalar_lea.hbm %s2101_s7, 32 }
 0x329   : > { %679 = vrot.lane.b32.xlu0 %v1879_v37, %s1463_s16 }
 0x330   : > { %789 = vrot.lane.b32.xlu1 %v1875_v34, %s1457_s29  ;;  %675 = vrot.lane.b32.xlu2 %v1888_v19, %s1463_s16  ;;  %s1002_s16 = sshll.u32 %s367_s28, 4  ;;  %s1003_s16 = int_to_ptr.vmem [resolvable:$true] %s1002_s16 }
 0x331   : > { %787 = vrot.lane.b32.xlu0 %v1888_v19, %s1457_s29 }
 0x338   : > { %791 = vrot.lane.b32.xlu1 %v1879_v37, %s1457_s29  ;;  %793 = vrot.lane.b32.xlu2 %v1877_v35, %s1457_s29  ;;  %s1147_s29 = sshll.u32 %s1532_s8, 4 }
 0x339   : > { %s1000_s13 = scalar_lea.hbm %s2101_s7, %s1147_s29 }
 0x33a   : > { %s1004_s2 = sshll.u32 %s1000_s13, 4  ;;  %s1005_s2 = int_to_ptr.hbm [resolvable:$true] %s1004_s2 }
 0x33b   : > { %s1386_s8 = sshra.s32 %s1005_s2, 4  ;;  %s1387_s8 = int_to_ptr.hbm [resolvable:$true] %s1386_s8 }
 0x33c   : > { %s1388_s26 = scalar_lea.hbm %s1387_s8, 16  ;;  %p1393_p7 = scmp.lt.s32.totalorder %s1387_s8, %s2101_s7 }
 0x33d   : > { %p1389_p1 = scmp.ne.s32.totalorder %s1387_s8, %s1388_s26  ;;  %p1394_p9 = scmp.lt.s32.totalorder %s1392_s23, %s1388_s26 }
 0x33f   : > { %p1390_p3 = pnand %p1389_p1, %p1577_p4  ;;  %p1395_p8 = por %p1394_p9, %p1393_p7 }
 0x341   : > { %p1391_p12 = pneg %p1390_p3 }
 0x342   : > { %v774_v18 = vpop.permute.xlu2 %773 }
 0x343   : > { %p1396_p10 = pnand %p1395_p8, %p1391_p12 }
 0x34a   : > { %v772_v29 = vpop.permute.xlu2 %771 }
 0x352   : > { %v762_v45 = vpop.permute.xlu2 %761 }
 0x35a   : > { %v778_v38 = vpop.permute.xlu1 %777  ;;  %v742_v46 = vpop.permute.xlu2 %741 }
 0x35b   : > { %v776_v41 = vpop.permute.xlu0 %775  ;;  %v780_v44 = vsel %vm451_vm0, %v774_v18, %v778_v38  ;;  %v782_v47 = vsel %vm451_vm0, %v778_v38, %v774_v18 }
 0x35c   : > { %v779_v3 = vsel %vm451_vm0, %v772_v29, %v776_v41  ;;  %v781_v36 = vsel %vm451_vm0, %v776_v41, %v772_v29  ;;  %v785_v49 = vmul.f32 %v780_v44, %v1718_v14  ;;  %v786_v50 = vmul.f32 %v782_v47, %v1721_v15 }
 0x35d   : > { %v783_v48 = vmul.f32 %v779_v3, %v1718_v14  ;;  %v784_v51 = vmul.f32 %v781_v36, %v1721_v15  ;;  %vm805_vm0 = vcmask 130048  }
 0x35e   : > { %809 = vmatpush.msra.mxu2 %v785_v49  ;;  %849 = vmatpush.msra.mxu3 %v786_v50 }
 0x360   : > { %810 = vmatpush.msra.mxu2 %v783_v48  ;;  %850 = vmatpush.msra.mxu3 %v784_v51 }
 0x362   : > { %v758_v52 = vpop.permute.xlu1 %757  ;;  %v744_v60 = vpop.permute.xlu2 %743 }
 0x363   : > { %v756_v53 = vpop.permute.xlu0 %755  ;;  %v764_v56 = vsel %vm440_vm2, %v758_v52, %v762_v45  ;;  %v766_v57 = vsel %vm440_vm2, %v762_v45, %v758_v52 }
 0x364   : > { %v769_v58 = vmul.f32 %v764_v56, %v1734_v22  ;;  %v770_v59 = vmul.f32 %v766_v57, %v1737_v23 }
 0x366   : > { %811 = vmatpush.msra.mxu2 %v769_v58  ;;  %851 = vmatpush.msra.mxu3 %v770_v59 }
 0x36a   : > { %v760_v14 = vpop.permute.xlu1 %759  ;;  %v724_v20 = vpop.permute.xlu2 %723 }
 0x36b   : > { %v746_v61 = vpop.permute.xlu0 %745  ;;  %v763_v15 = vsel %vm440_vm2, %v756_v53, %v760_v14  ;;  %v765_v62 = vsel %vm440_vm2, %v760_v14, %v756_v53 }
 0x36c   : > { %v748_v4 = vsel %vm429_vm3, %v742_v46, %v746_v61  ;;  %v750_v5 = vsel %vm429_vm3, %v746_v61, %v742_v46  ;;  %v767_v7 = vmul.f32 %v763_v15, %v1734_v22  ;;  %v768_v12 = vmul.f32 %v765_v62, %v1737_v23 }
 0x36d   : > { %v753_v13 = vmul.f32 %v748_v4, %v1749_v31  ;;  %v754_v17 = vmul.f32 %v750_v5, %v1752_v32 }
 0x36e   : > { %812 = vmatpush.msra.mxu2 %v767_v7  ;;  %852 = vmatpush.msra.mxu3 %v768_v12  ;;  %v803_v12 = vld [vmem:[#allocation8] sm:$0xff] }
 0x370   : > { %813 = vmatpush.msra.mxu2 %v753_v13  ;;  %853 = vmatpush.msra.mxu3 %v754_v17 }
 0x372   : > { %v740_v21 = vpop.permute.xlu1 %739  ;;  %v714_v25 = vpop.permute.xlu2 %713 }
 0x373   : > { %v726_v24 = vpop.permute.xlu0 %725  ;;  %v747_v16 = vsel %vm429_vm3, %v740_v21, %v744_v60  ;;  %v749_v8 = vsel %vm429_vm3, %v744_v60, %v740_v21 }
 0x374   : > { %v751_v22 = vmul.f32 %v747_v16, %v1749_v31  ;;  %v752_v23 = vmul.f32 %v749_v8, %v1752_v32 }
 0x376   : > { %814 = vmatpush.msra.mxu2 %v751_v22  ;;  %854 = vmatpush.msra.mxu3 %v752_v23 }
 0x378   : > { %815 = vmatpush.msra.mxu2 %v1875_v34  ;;  %855 = vmatpush.msra.mxu3 %v1877_v35 }
 0x37a   : > { %v730_v26 = vpop.permute.xlu1 %729  ;;  %816 = vmatpush.msra.mxu2 %v1888_v19  ;;  %856 = vmatpush.msra.mxu3 %v1879_v37  ;;  %v694_v38 = vpop.permute.xlu2 %693 }
 0x37b   : > { %v728_v27 = vpop.permute.xlu0 %727  ;;  %v732_v30 = vsel %vm418_vm4, %v726_v24, %v730_v26  ;;  %v734_v31 = vsel %vm418_vm4, %v730_v26, %v726_v24  ;;  %v804_v26 = vld [vmem:[#allocation8 + $0x8] sm:$0xff] }
 0x37c   : > { %v731_v32 = vsel %vm418_vm4, %v724_v20, %v728_v27  ;;  %v733_v33 = vsel %vm418_vm4, %v728_v27, %v724_v20  ;;  %v737_v34 = vmul.f32 %v734_v31, %v1762_v39  ;;  %v738_v35 = vmul.f32 %v732_v30, %v1767_v40  ;;  %v373_v31 = vld [vmem:[%s321_s18] sm:$0xff] }
 0x37d   : > { %v735_v37 = vmul.f32 %v733_v33, %v1762_v39  ;;  %v736_v28 = vmul.f32 %v731_v32, %v1767_v40  ;;  %v374_v33 = vld [vmem:[%s321_s18 + $0x8] sm:$0xff] }
 0x37e   : > { %817 = vmatpush.msra.mxu2 %v737_v34  ;;  %857 = vmatpush.msra.mxu3 %v738_v35 }
 0x380   : > { %818 = vmatpush.msra.mxu2 %v735_v37  ;;  %858 = vmatpush.msra.mxu3 %v736_v28 }
 0x382   : > { %v710_v19 = vpop.permute.xlu1 %709  ;;  %v696_v48 = vpop.permute.xlu2 %695 }
 0x383   : > { %v708_v18 = vpop.permute.xlu0 %707  ;;  %v716_v29 = vsel %vm407_vm5, %v710_v19, %v714_v25  ;;  %v718_v45 = vsel %vm407_vm5, %v714_v25, %v710_v19 }
 0x384   : > { %v721_v41 = vmul.f32 %v718_v45, %v1771_v42  ;;  %v722_v44 = vmul.f32 %v716_v29, %v1774_v43 }
 0x386   : > { %819 = vmatpush.msra.mxu2 %v721_v41  ;;  %859 = vmatpush.msra.mxu3 %v722_v44 }
 0x38a   : > { %v712_v39 = vpop.permute.xlu1 %711  ;;  %v676_v59 = vpop.permute.xlu2 %675 }
 0x38b   : > { %v698_v47 = vpop.permute.xlu0 %697  ;;  %v715_v40 = vsel %vm407_vm5, %v708_v18, %v712_v39  ;;  %v717_v3 = vsel %vm407_vm5, %v712_v39, %v708_v18 }
 0x38c   : > { %v700_v36 = vsel %vm396_vm6, %v694_v38, %v698_v47  ;;  %v702_v46 = vsel %vm396_vm6, %v698_v47, %v694_v38  ;;  %v719_v49 = vmul.f32 %v717_v3, %v1771_v42  ;;  %v720_v50 = vmul.f32 %v715_v40, %v1774_v43 }
 0x38d   : > { %v705_v51 = vmul.f32 %v702_v46, %v1790_v54  ;;  %v706_v52 = vmul.f32 %v700_v36, %v1793_v55 }
 0x38e   : > { %820 = vmatpush.msra.mxu2 %v719_v49  ;;  %860 = vmatpush.msra.mxu3 %v720_v50 }
 0x390   : > { %821 = vmatpush.msra.mxu2 %v705_v51  ;;  %861 = vmatpush.msra.mxu3 %v706_v52 }
 0x392   : > { %v692_v53 = vpop.permute.xlu1 %691  ;;  %v794_v13 = vpop.permute.xlu2 %793 }
 0x393   : > { %v678_v56 = vpop.permute.xlu0 %677  ;;  %v699_v57 = vsel %vm396_vm6, %v692_v53, %v696_v48  ;;  %v701_v58 = vsel %vm396_vm6, %v696_v48, %v692_v53  ;;  %v891_v48 = vld [vmem:[%s2100_s6] sm:$0xff] }
 0x394   : > { %v703_v42 = vmul.f32 %v701_v58, %v1790_v54  ;;  %v704_v43 = vmul.f32 %v699_v57, %v1793_v55 }
 0x396   : > { %822 = vmatpush.msra.mxu2 %v703_v42  ;;  %862 = vmatpush.msra.mxu3 %v704_v43 }
 0x39a   : > { %v682_v60 = vpop.permute.xlu1 %681 }
 0x39b   : > { %v680_v14 = vpop.permute.xlu0 %679  ;;  %v684_v61 = vsel %vm385_vm7, %v678_v56, %v682_v60  ;;  %v686_v15 = vsel %vm385_vm7, %v682_v60, %v678_v56 }
 0x39c   : > { %v683_v62 = vsel %vm385_vm7, %v676_v59, %v680_v14  ;;  %v685_v4 = vsel %vm385_vm7, %v680_v14, %v676_v59  ;;  %v689_v54 = vmul.f32 %v686_v15, %v1803_v63  ;;  %v690_v55 = vmul.f32 %v684_v61, %v1806_v2 }
 0x39d   : > { %v687_v5 = vmul.f32 %v685_v4, %v1803_v63  ;;  %v688_v7 = vmul.f32 %v683_v62, %v1806_v2 }
 0x39e   : > { %823 = vmatpush.msra.mxu2 %v689_v54  ;;  %863 = vmatpush.msra.mxu3 %v690_v55 }
 0x3a0   : > { %824 = vmatpush.msra.mxu2 %v687_v5  ;;  %864 = vmatpush.msra.mxu3 %v688_v7 }
 0x3a1   : > { %825 = vmatmul.f32.vlgmr.msra.gmra.mxu2 %v803_v12  ;;  %865 = vmatmul.f32.vlgmr.msra.gmra.mxu3 %v803_v12  ;;  %v1466_v12 = vmov 2  }
 0x3a2   : > { %v790_v17 = vpop.permute.xlu1 %789  ;;  %1240 = vset.pattern.permute.xlu2 %v1466_v12 }
 0x3a3   : > { %v796_v20 = vsel %vm462_vm1, %v790_v17, %v794_v13  ;;  %v798_v21 = vsel %vm462_vm1, %v794_v13, %v790_v17  ;;  %v788_v63 = vpop.permute.xlu0 %787 }
 0x3a4   : > { %v801_v24 = vmul.f32 %v1709_v10, %v796_v20  ;;  %v802_v16 = vmul.f32 %v1714_v11, %v798_v21 }
 0x3a6   : > { %843 = vmatpush.msrb.mxu1 %v801_v24  ;;  %883 = vmatpush.msrb.mxu0 %v802_v16 }
 0x3aa   : > { %v792_v2 = vpop.permute.xlu1 %791 }
 0x3ab   : > { %v795_v8 = vsel %vm462_vm1, %v788_v63, %v792_v2  ;;  %v797_v22 = vsel %vm462_vm1, %v792_v2, %v788_v63 }
 0x3ac   : > { %v799_v23 = vmul.f32 %v1709_v10, %v795_v8  ;;  %v800_v25 = vmul.f32 %v1714_v11, %v797_v22 }
 0x3ae   : > { %844 = vmatpush.msrb.mxu1 %v799_v23  ;;  %884 = vmatpush.msrb.mxu0 %v800_v25 }
 0x3af   : > { %1138 = vmatmul.msk.f32.vlgmr.msrb.gmra.mxu1 %vm805_vm0, %v804_v26  ;;  %1139 = vmatmul.msk.f32.vlgmr.msrb.gmra.mxu0 %vm805_vm0, %v804_v26 }
 0x424   : > { %v826_v27 = vpop.f32.mrf.mxu2  ;;  %v866_v30 = vpop.f32.mrf.mxu3 }
 0x42c   : > { %v846_v32 = vpop.f32.mrf.mxu1  ;;  %v886_v34 = vpop.f32.mrf.mxu0 }
 0x42d   : > { %v847_v6 = vadd.f32 %v846_v32, %v826_v27  ;;  %v887_v35 = vadd.f32 %v886_v34, %v866_v30 }
 0x42f   : > { %v889_v37 = vadd.f32 %v847_v6, %v373_v31  ;;  %v890_v10 = vadd.f32 %v887_v35, %v374_v33  ;;  %v1467_v31 = vmov 3  }
 0x430   : > { %1241 = vset.pattern.permute.xlu0 %v1467_v31 }
 0x431   : > { %v892_v28 = vadd.f32 %v890_v10, %v889_v37  ;;  %v895_v11 = vmul.f32 %v889_v37, %v889_v37  ;;  %v896_v19 = vmul.f32 %v890_v10, %v890_v10 }
 0x433   : > { %893 = vadd.xlane.f32.xlu2 %v892_v28  ;;  %v897_v18 = vadd.f32 %v896_v19, %v895_v11 }
 0x435   : > { %898 = vadd.xlane.f32.xlu0 %v897_v18 }
 0x4a6   : > { %v894_v29 = vpop.xlane.xlu2 %893 }
 0x4a7   : > { %v900_v45 = vmul.f32 0.00390625, %v894_v29 }
 0x4a8   : > { %v899_v38 = vpop.xlane.xlu0 %898 }
 0x4a9   : > { %v902_v41 = vmul.f32 %v900_v45, %v900_v45  ;;  %v901_v44 = vmul.f32 0.00390625, %v899_v38 }
 0x4ab   : > { %v903_v39 = vsub.f32 %v901_v44, %v902_v41 }
 0x4ad   : > { %v904_v47 = vmax.f32 %v903_v39, 0.0 }
 0x4af   : > { %v905_v40 = vadd.f32 1e-05, %v904_v47 }
 0x4b1   : > { %1248 = vrsqrt.f32 %v905_v40  ;;  %vm912_vm2 = vweird.f32 %v905_v40 }
 0x4b7   : > { %v1249_v3 = vpop.eup %1248 }
 0x4b8   : > { %v907_v36 = vmul.f32 %v1249_v3, %v905_v40  ;;  %vm913_vm1 = vweird.f32 %v1249_v3 }
 0x4b9   : > { %vm914_vm3 = vmor %vm912_vm2, %vm913_vm1 }
 0x4ba   : > { %v908_v46 = vmul.f32 %v1249_v3, %v907_v36 }
 0x4bc   : > { %v909_v49 = vmul.f32 0.5, %v908_v46 }
 0x4be   : > { %v910_v50 = vsub.f32 1.5, %v909_v49 }
 0x4c0   : > { %v911_v51 = vmul.f32 %v1249_v3, %v910_v50 }
 0x4c2   : > { %v915_v52 = vsel %vm914_vm3, %v1249_v3, %v911_v51 }
 0x4c3   : > { %v916_v53 = vmul.f32 %v915_v52, %v891_v48 }
 0x4c5   : > { %v917_v56 = vmul.f32 %v916_v53, %v900_v45 }
 0x4c7   : > { %919 = vrot.lane.b32.xlu1 %v917_v56, %s1460_s30 }
 0x4cf   : > { %925 = vperm.xlu1 %1238, %v916_v53  }
 0x4d7   : > { %1239 = vset.pattern.permute.xlu1 %v1465_v9 }
 0x539   : > { %v920_v57 = vpop.permute.xlu1 %919 }
 0x53a   : > { %v922_v58 = vsub.f32 %v891_v48, %v920_v57 }
 0x53c   : > { %932 = vperm.xlu1 %1239, %v922_v58  }
 0x541   : > { %v926_v42 = vpop.permute.xlu1 %925 }
 0x542   : > { %v928_v43 = vmul.f32 %v926_v42, %v889_v37  ;;  %v929_v59 = vmul.f32 %v926_v42, %v890_v10 }
 0x5ae   : > { %v933_v60 = vpop.permute.xlu1 %932 }
 0x5af   : > { %v935_v14 = vadd.f32 %v933_v60, %v928_v43  ;;  %v936_v61 = vadd.f32 %v933_v60, %v929_v59 }
 0x5b1   : > { %v937_v15 = vadd.f32 %v935_v14, %v1655_v0  ;;  %v938_v62 = vadd.f32 %v936_v61, %v1663_v1 }
 0x5b3   : > { %v939_v4 = vmax.f32 %v937_v15, 0.0  ;;  %v940_v54 = vmax.f32 %v938_v62, 0.0 }
 0x5b5   : > { %v941_v55 = vadd.f32 %v940_v54, %v939_v4  ;;  %v944_v5 = vmul.f32 %v939_v4, %v939_v4  ;;  %v945_v7 = vmul.f32 %v940_v54, %v940_v54 }
 0x5b7   : > { %942 = vadd.xlane.f32.xlu1 %v941_v55  ;;  %v946_v9 = vadd.f32 %v945_v7, %v944_v5 }
 0x5b9   : > { %947 = vadd.xlane.f32.xlu2 %v946_v9 }
 0x62a   : > { %v943_v13 = vpop.xlane.xlu1 %942 }
 0x62b   : > { %v949_v17 = vmul.f32 0.00390625, %v943_v13 }
 0x62c   : > { %v948_v20 = vpop.xlane.xlu2 %947 }
 0x62d   : > { %v951_v21 = vmul.f32 %v949_v17, %v949_v17  ;;  %v950_v24 = vmul.f32 0.00390625, %v948_v20 }
 0x62f   : > { %v952_v16 = vsub.f32 %v950_v24, %v951_v21 }
 0x631   : > { %v953_v63 = vmax.f32 %v952_v16, 0.0 }
 0x633   : > { %v954_v0 = vadd.f32 1e-05, %v953_v63 }
 0x635   : > { %1250 = vrsqrt.f32 %v954_v0  ;;  %vm961_vm5 = vweird.f32 %v954_v0 }
 0x63b   : > { %v1251_v1 = vpop.eup %1250 }
 0x63c   : > { %v956_v2 = vmul.f32 %v1251_v1, %v954_v0  ;;  %vm962_vm4 = vweird.f32 %v1251_v1 }
 0x63d   : > { %vm963_vm6 = vmor %vm961_vm5, %vm962_vm4 }
 0x63e   : > { %v957_v8 = vmul.f32 %v1251_v1, %v956_v2 }
 0x640   : > { %v958_v22 = vmul.f32 0.5, %v957_v8 }
 0x642   : > { %v959_v23 = vsub.f32 1.5, %v958_v22 }
 0x644   : > { %v960_v25 = vmul.f32 %v1251_v1, %v959_v23 }
 0x646   : > { %v964_v26 = vsel %vm963_vm6, %v1251_v1, %v960_v25 }
 0x647   : > { %v965_v27 = vmul.f32 %v964_v26, %v891_v48 }
 0x649   : > { %974 = vperm.xlu2 %1240, %v965_v27   ;;  %v966_v30 = vmul.f32 %v965_v27, %v949_v17 }
 0x64b   : > { %968 = vrot.lane.b32.xlu0 %v966_v30, %s1460_s30  ;;  %s989_s30 = scalar_lea.sflag [#allocation4], %s1630_s3 }
 0x6a3   : > { %v975_v34 = vpop.permute.xlu2 %974 }
 0x6a4   : > { %v977_v6 = vmul.f32 %v975_v34, %v939_v4  ;;  %v978_v35 = vmul.f32 %v975_v34, %v940_v54 }
 0x6bd   : > { %v969_v32 = vpop.permute.xlu0 %968 }
 0x6be   : > { %v971_v33 = vsub.f32 %v891_v48, %v969_v32 }
 0x6c0   : > { %981 = vperm.xlu0 %1241, %v971_v33  }
 0x732   : > { %v982_v37 = vpop.permute.xlu0 %981 }
 0x733   : > { %v984_v10 = vadd.f32 %v982_v37, %v977_v6  ;;  %v985_v28 = vadd.f32 %v982_v37, %v978_v35 }
 0x735   : > { %986 = vst [vmem:[%s367_s28] sm:$0xff] %v984_v10 }
 0x736   : > { %987 = vst [vmem:[%s367_s28 + $0x8] sm:$0xff] %v985_v28 }
 0x737   : > { %1399 = shalt.err (!%p1396_p10)
}
 0x738   : > { %1160 = dma.vmem_to_hbm [thread:$0]  (%p1577_p4), %s1003_s16, 256, %s1005_s2, %s989_s30  }
 0x739 PF: > { %s2124_s3 = sld [smem:[#allocation17_spill]]  ;;  %s1016_s14 = sand.u32 1, %s1438_s24  }
 0x73a   : > { %s1017_s15 = scalar_lea.sflag [#allocation4], %s1016_s14 }
 0x73f   : > { %p2125_p11 = scmp.ge.s32.totalorder %s2124_s3, 2 }
 0x741   : > { %p1177_p5 = pnand %p2125_p11, %p1581_p6 }
 0x743   : > { %p1178_p13 = pneg %p1177_p5 }
 0x745   : > { %1433 = dma.done.wait (%p1178_p13), %s1017_s15, 256  }
 0x746   : > { %1435 = vsyncadd (%p1178_p13), %s1017_s15, 4294967040  ;;  %s2126_s27 = sld [smem:[#allocation18_spill]]  ;;  %s2129_s24 = smov %s1442_s25 }
 0x747   : > { %s2127_s17 = sld [smem:[#allocation16_spill]] }
 0x748   : > { %s2128_s26 = sld [smem:[#allocation19_spill]] }
 0x74c   : > { %p24_p0 = scmp.ge.s32.totalorder %s2126_s27, 4  }
 0x74d   : > { %s2130_s25 = smov %s2127_s17 }
 0x74e   :  { %26 = sbr.rel (!%p24_p0) target bundleno = 11 (0xb), region = 114 }
 0x753   :  { %1023 = vsyncpa [#allocation3], 1 }
 0x754   :  { %1025 = vsyncpa [#allocation3 + $0x1], 1 }
 0x755   :  { %1026 = vsyncpa [#allocation6], 1 }
 0x756   :  { %1028 = vsyncpa [#allocation6 + $0x1], 1 }
 0x757   :  { %1029 = vsyncpa [#allocation9], 1 }
 0x758   :  { %1030 = vsyncpa [#allocation4], 1 }
 0x759   :  { %1032 = vsyncpa [#allocation4 + $0x1], 1 }

</bundles_post_ra>
